<compile_context>
chip_gen: v6e
topology: v6e:2x2x1
jax: 0.10.0
libtpu: 0.0.40
codegen_flags: <defaults>
</compile_context>

<pallas_src>
import jax
import jax.numpy as jnp
from jax.experimental import pallas as pl
from jax.experimental.pallas import tpu as pltpu

LANE = 128      # TPU lane width: keep last dims at multiples of 128
SUBLANE = 8     # sublane granularity for the second-to-last dim


def _round_up(x, m):
    return (x + m - 1) // m * m


def _cdiv(a, b):
    return -(-a // b)


# --------------------------------------------------------------------------- kernel
def _odelstm_kernel(xh_ref, c_ref, ts_ref,
                    w_cat_ref, b_ref, w1_ref, b1_ref, w2_ref, b2_ref,
                    h_out_ref, c_out_ref):
    """One batch tile of the ODE-LSTM cell (fused LSTMCell + 3 fixed RK4 steps)."""
    xh = xh_ref[...]                     # (TB, D+Hp) f32  ([x, h] pre-concatenated)
    c = c_ref[...]                       # (TB, Hp)   f32
    tb, hp = c.shape

    # ---- fused LSTMCell: gates = [x,h] @ [W_ih; W_hh]^T + (b_ih + b_hh) ----
    # bf16 MXU operands, f32 accumulation / bias / activations.
    gates = (jnp.dot(xh.astype(jnp.bfloat16), w_cat_ref[...],
                     preferred_element_type=jnp.float32)
             + b_ref[...])               # (TB, 4*Hp); each gate is a 128-lane block

    i_g = jax.nn.sigmoid(gates[:, 0 * hp:1 * hp])   # tile-aligned slices
    f_g = jax.nn.sigmoid(gates[:, 1 * hp:2 * hp])
    g_g = jnp.tanh(gates[:, 2 * hp:3 * hp])
    o_g = jax.nn.sigmoid(gates[:, 3 * hp:4 * hp])

    new_c = f_g * c + i_g * g_g
    # Store c immediately: otherwise it stays live across all 12 f_node
    # evaluations (vreg pressure / spills in the hottest region).
    c_out_ref[...] = new_c
    new_h = o_g * jnp.tanh(new_c)

    # ---- f_node(y) = W2 @ tanh(W1 @ y + b1) + b2 ---------------------------
    w1 = w1_ref[...]                     # (Hp, Hp) bf16
    b1 = b1_ref[...]                     # (1, Hp)  f32
    w2 = w2_ref[...]                     # (Hp, Hp) bf16
    b2 = b2_ref[...]                     # (1, Hp)  f32

    def f_node(y):                       # y: (TB, Hp) f32
        z = jnp.tanh(jnp.dot(y.astype(jnp.bfloat16), w1,
                             preferred_element_type=jnp.float32) + b1)
        return jnp.dot(z.astype(jnp.bfloat16), w2,
                       preferred_element_type=jnp.float32) + b2

    # ---- solve_fixed: 3 RK4 steps with delta_t = ts / 3 --------------------
    # Only one (TB, Hp) constant (dt) is kept live; 0.5 and 1/6 stay scalar
    # immediates (cheap VALU ops) instead of extra full-size broadcasts.
    dt = jnp.broadcast_to(ts_ref[...], (tb, hp)) * (1.0 / 3.0)

    def rk4_step(_, y):
        k1 = f_node(y)
        k2 = f_node(y + (k1 * dt) * 0.5)
        k3 = f_node(y + (k2 * dt) * 0.5)
        k4 = f_node(y + k3 * dt)
        return y + dt * ((k1 + 2.0 * k2 + 2.0 * k3 + k4) * (1.0 / 6.0))

    # fori_loop (not a static unroll) bounds live ranges across the 24 matmuls.
    y_final = jax.lax.fori_loop(0, 3, rk4_step, new_h)

    # Lane-dense store (Hp is a multiple of 128); wrapper slices back to H.
    h_out_ref[...] = y_final


# --------------------------------------------------------------------------- wrapper
def ode_lstm_cell(x, h0, c0, ts, padded_params, *, hidden_size, tile_b_max=256):
    """ODELSTMCell forward. x:(B,D), h0/c0:(B,H), ts:(B,1) -> (new_h, new_c)."""
    B, D = x.shape
    H = hidden_size
    p = padded_params
    Hp = p["w1"].shape[0]

    # tile_b: >= 2 grid steps (shards across both TCs on v7x), multiple of 8
    # sublanes, sized from B to minimize batch padding, capped at tile_b_max.
    n_tiles = max(2, _cdiv(B, tile_b_max))
    tile_b = max(SUBLANE, _round_up(_cdiv(B, n_tiles), SUBLANE))
    Bp = _round_up(B, tile_b)
    grid = (Bp // tile_b,)

    # Zero-pad batch to a tile multiple and hidden to Hp lanes, and fuse [x, h]
    # into one matmul LHS. Zero padding keeps padded lanes identically zero
    # through the whole computation (incl. the RK4 chain).
    pad_b = Bp - B
    x_p = jnp.pad(x, ((0, pad_b), (0, 0)))
    h_p = jnp.pad(h0, ((0, pad_b), (0, Hp - H)))
    xh = jnp.concatenate([x_p, h_p], axis=1)            # (Bp, D+Hp)
    c_p = jnp.pad(c0, ((0, pad_b), (0, Hp - H)))
    ts_p = jnp.pad(ts, ((0, pad_b), (0, 0)))

    inputs = (xh, c_p, ts_p,
              p["w_cat"], p["b_lstm"], p["w1"], p["b1"], p["w2"], p["b2"])

    weight_bytes = sum(int(a.size) * a.dtype.itemsize
                       for a in (p["w_cat"], p["b_lstm"], p["w1"],
                                 p["b1"], p["w2"], p["b2"]))
    # Per-tile f32 I/O (xh, c, ts in; h, c out), double-buffered by the pipeline.
    tile_io_bytes = 4 * tile_b * ((D + Hp) + Hp + 1 + 2 * Hp)
    # Headroom for gates (TB,4Hp) + RK4 temporaries.
    scratch_bytes = 4 * tile_b * (4 * Hp + 6 * Hp)

    # Advisory cost estimate (1 fused LSTM matmul + 24 f_node matmuls;
    # ~17 transcendentals per hidden element).
    flops = 2 * Bp * ((D + Hp) * 4 * Hp + 24 * Hp * Hp)
    transcendentals = Bp * Hp * 17
    bytes_accessed = 4 * Bp * (D + 4 * Hp + 1) + weight_bytes

    def batch_spec(width):
        return pl.BlockSpec((tile_b, width), lambda i: (i, 0))

    def run(single_buffer_weights):
        def const_spec(shape):
            if single_buffer_weights:
                # Weights never change across grid steps: one VMEM buffer is
                # enough (frees VMEM for larger batch tiles, esp. v7x 64 MiB).
                return pl.BlockSpec(shape, lambda i: (0, 0),
                                    pipeline_mode=pl.Buffered(1))
            return pl.BlockSpec(shape, lambda i: (0, 0))

        in_specs = [
            batch_spec(D + Hp),                 # [x, h]
            batch_spec(Hp),                     # c0
            batch_spec(1),                      # ts
            const_spec(p["w_cat"].shape),
            const_spec(p["b_lstm"].shape),
            const_spec(p["w1"].shape),
            const_spec(p["b1"].shape),
            const_spec(p["w2"].shape),
            const_spec(p["b2"].shape),
        ]
        out_specs = (batch_spec(Hp), batch_spec(Hp))

        weight_copies = 1 if single_buffer_weights else 2
        footprint = weight_copies * weight_bytes + 2 * tile_io_bytes + scratch_bytes
        vmem_limit = int(min(64 << 20, max(2 * footprint, 8 << 20)))

        return pl.pallas_call(
            _odelstm_kernel,
            out_shape=(jax.ShapeDtypeStruct((Bp, Hp), jnp.float32),
                       jax.ShapeDtypeStruct((Bp, Hp), jnp.float32)),
            grid=grid,
            in_specs=in_specs,
            out_specs=out_specs,
            compiler_params=pltpu.CompilerParams(
                dimension_semantics=("parallel",),      # megacore shard on v7x
                vmem_limit_bytes=vmem_limit),
            cost_estimate=pl.CostEstimate(flops=flops,
                                          transcendentals=transcendentals,
                                          bytes_accessed=bytes_accessed),
        )(*inputs)

    try:
        new_h_p, new_c_p = run(single_buffer_weights=True)
    except Exception:
        # pl.Buffered(1) / pipeline_mode not supported on this jax version:
        # fall back to default double-buffered weight specs (same semantics).
        new_h_p, new_c_p = run(single_buffer_weights=False)

    # TODO(synk): for recurrent sequence stepping, keep h/c in the padded
    # (Bp, Hp) layout between steps and alias them via input_output_aliases
    # (or move the time loop into the kernel with h/c in VMEM scratch) to avoid
    # per-step pad/concat and HBM round-trips of the hidden state.
    return new_h_p[:B, :H], new_c_p[:B, :H]


# --------------------------------------------------------------------------- params
def make_params(key, input_size, hidden_size):
    """Deterministic synthetic parameters (PyTorch-like uniform init), f32."""
    ks = jax.random.split(key, 8)
    bound = 1.0 / jnp.sqrt(hidden_size)

    def u(k, shape):
        return jax.random.uniform(k, shape, jnp.float32, -bound, bound)

    # PyTorch LSTMCell: W_ih (4H, D), W_hh (4H, H), b_ih/b_hh (4H,).
    w_ih = u(ks[0], (4 * hidden_size, input_size))
    w_hh = u(ks[1], (4 * hidden_size, hidden_size))
    b_ih = u(ks[2], (4 * hidden_size,))
    b_hh = u(ks[3], (4 * hidden_size,))
    # f_node: Linear(H,H) -> Tanh -> Linear(H,H); PyTorch Linear weight is (out,in).
    w1 = u(ks[4], (hidden_size, hidden_size))
    b1 = u(ks[5], (hidden_size,))
    w2 = u(ks[6], (hidden_size, hidden_size))
    b2 = u(ks[7], (hidden_size,))

    return {
        "w_ih_t": w_ih.T,                                   # (D, 4H)
        "w_hh_t": w_hh.T,                                   # (H, 4H)
        "b_lstm": (b_ih + b_hh).reshape(1, 4 * hidden_size),
        "w1_t": w1.T,                                       # (H, H)
        "b1": b1.reshape(1, hidden_size),
        "w2_t": w2.T,                                       # (H, H)
        "b2": b2.reshape(1, hidden_size),
    }


def pad_params(params, hidden_size):
    """Pad hidden dims to 128 lanes, fuse [W_ih; W_hh], store matmul weights bf16.

    Each LSTM gate gets its own lane-aligned 128-wide column block so in-kernel
    gate slices are full-vreg reads and all stores are lane-dense. Zero padding
    keeps padded lanes identically zero end to end. Biases stay f32 (added to
    the f32 accumulators); only MXU operands are bf16.
    """
    H = hidden_size
    Hp = _round_up(H, LANE)

    def pad_gate_cols(w):
        parts = []
        for g in range(4):
            blk = w[..., g * H:(g + 1) * H]
            pad = [(0, 0)] * (w.ndim - 1) + [(0, Hp - H)]
            parts.append(jnp.pad(blk, pad))
        return jnp.concatenate(parts, axis=-1)

    w_ih = pad_gate_cols(params["w_ih_t"])                                  # (D, 4Hp)
    w_hh = pad_gate_cols(jnp.pad(params["w_hh_t"], ((0, Hp - H), (0, 0))))  # (Hp, 4Hp)

    return {
        "w_cat": jnp.concatenate([w_ih, w_hh], axis=0).astype(jnp.bfloat16),  # (D+Hp, 4Hp)
        "b_lstm": pad_gate_cols(params["b_lstm"]),                             # (1, 4Hp) f32
        "w1": jnp.pad(params["w1_t"], ((0, Hp - H), (0, Hp - H))).astype(jnp.bfloat16),
        "b1": jnp.pad(params["b1"], ((0, 0), (0, Hp - H))),                    # (1, Hp) f32
        "w2": jnp.pad(params["w2_t"], ((0, Hp - H), (0, Hp - H))).astype(jnp.bfloat16),
        "b2": jnp.pad(params["b2"], ((0, 0), (0, Hp - H))),                    # (1, Hp) f32
    }


# --------------------------------------------------------------------------- reference
def _reference(x, h0, c0, ts, p):
    """Plain-JAX f32 reference of the same math (unpadded, unfused)."""
    gates = x @ p["w_ih_t"] + h0 @ p["w_hh_t"] + p["b_lstm"]
    H = h0.shape[-1]
    i = jax.nn.sigmoid(gates[:, 0 * H:1 * H])
    f = jax.nn.sigmoid(gates[:, 1 * H:2 * H])
    g = jnp.tanh(gates[:, 2 * H:3 * H])
    o = jax.nn.sigmoid(gates[:, 3 * H:4 * H])
    new_c = f * c0 + i * g
    y = o * jnp.tanh(new_c)

    def f_node(v):
        return jnp.tanh(v @ p["w1_t"] + p["b1"]) @ p["w2_t"] + p["b2"]

    dt = ts * (1.0 / 3.0)
    for _ in range(3):
        k1 = f_node(y)
        k2 = f_node(y + k1 * dt * 0.5)
        k3 = f_node(y + k2 * dt * 0.5)
        k4 = f_node(y + k3 * dt)
        y = y + dt * (k1 + 2 * k2 + 2 * k3 + k4) / 6.0
    return y, new_c


if __name__ == "__main__":
    B, D, H = 16, 16, 32
    key = jax.random.PRNGKey(0)
    k_x, k_h, k_c, k_t, k_p = jax.random.split(key, 5)

    x = jax.random.normal(k_x, (B, D), jnp.float32)
    h0 = jax.random.normal(k_h, (B, H), jnp.float32)
    c0 = jax.random.normal(k_c, (B, H), jnp.float32)
    ts = jax.random.uniform(k_t, (B, 1), jnp.float32, 0.1, 1.0)   # elapsed times

    params = make_params(k_p, D, H)
    padded = pad_params(params, H)          # done once; reused across calls

    new_h, new_c = ode_lstm_cell(x, h0, c0, ts, padded, hidden_size=H)
    jax.block_until_ready((new_h, new_c))

    ref_h, ref_c = _reference(x, h0, c0, ts, params)
    assert new_h.shape == (B, H) and new_c.shape == (B, H)
    # bf16 MXU operands vs. f32 reference -> loosened tolerance.
    assert jnp.allclose(new_h, ref_h, atol=3e-2, rtol=3e-2)
    assert jnp.allclose(new_c, ref_c, atol=3e-2, rtol=3e-2)

    print("KERNEL_OK")
</pallas_src>

<mosaic_0001>
module attributes {stable_mosaic.version = 11 : i64} {
  func.func @_odelstm_kernel(%arg0: i32, %arg1: memref<8x144xf32, #tpu.memory_space<vmem>>, %arg2: memref<8x128xf32, #tpu.memory_space<vmem>>, %arg3: memref<8x1xf32, #tpu.memory_space<vmem>>, %arg4: memref<144x512xbf16, #tpu.memory_space<vmem>>, %arg5: memref<1x512xf32, #tpu.memory_space<vmem>>, %arg6: memref<128x128xbf16, #tpu.memory_space<vmem>>, %arg7: memref<1x128xf32, #tpu.memory_space<vmem>>, %arg8: memref<128x128xbf16, #tpu.memory_space<vmem>>, %arg9: memref<1x128xf32, #tpu.memory_space<vmem>>, %arg10: memref<8x128xf32, #tpu.memory_space<vmem>>, %arg11: memref<8x128xf32, #tpu.memory_space<vmem>>) attributes {dimension_semantics = [#tpu.dimension_semantics<parallel>], iteration_bounds = array<i64: 2>, scalar_prefetch = 0 : i64, scratch_operands = 0 : i64, tpu.core_type = #tpu.core_type<tc>, window_params = [{transform_indices = @transform_0, window_bounds = array<i64: 8, 144>}, {transform_indices = @transform_1, window_bounds = array<i64: 8, 128>}, {transform_indices = @transform_2, window_bounds = array<i64: 8, 1>}, {pipeline_mode = #tpu.pipeline_mode<synchronous>, transform_indices = @transform_3, window_bounds = array<i64: 144, 512>}, {pipeline_mode = #tpu.pipeline_mode<synchronous>, transform_indices = @transform_4, window_bounds = array<i64: 1, 512>}, {pipeline_mode = #tpu.pipeline_mode<synchronous>, transform_indices = @transform_5, window_bounds = array<i64: 128, 128>}, {pipeline_mode = #tpu.pipeline_mode<synchronous>, transform_indices = @transform_6, window_bounds = array<i64: 1, 128>}, {pipeline_mode = #tpu.pipeline_mode<synchronous>, transform_indices = @transform_7, window_bounds = array<i64: 128, 128>}, {pipeline_mode = #tpu.pipeline_mode<synchronous>, transform_indices = @transform_8, window_bounds = array<i64: 1, 128>}, {transform_indices = @transform_9, window_bounds = array<i64: 8, 128>}, {transform_indices = @transform_10, window_bounds = array<i64: 8, 128>}]} {
    %c0 = arith.constant 0 : index
    %c0_0 = arith.constant 0 : index
    %0 = vector.load %arg1[%c0, %c0_0] : memref<8x144xf32, #tpu.memory_space<vmem>>, vector<8x144xf32>
    %c0_1 = arith.constant 0 : index
    %c0_2 = arith.constant 0 : index
    %1 = vector.load %arg2[%c0_1, %c0_2] : memref<8x128xf32, #tpu.memory_space<vmem>>, vector<8x128xf32>
    %2 = arith.truncf %0 : vector<8x144xf32> to vector<8x144xbf16>
    %c0_3 = arith.constant 0 : index
    %c0_4 = arith.constant 0 : index
    %3 = vector.load %arg4[%c0_3, %c0_4] : memref<144x512xbf16, #tpu.memory_space<vmem>>, vector<144x512xbf16>
    %cst = arith.constant dense<0.000000e+00> : vector<8x512xf32>
    %4 = tpu.matmul %2, %3, %cst {dimension_numbers = #tpu.dot_dimension_numbers<[1], [0], [0], [1], [0, 0, 1, 1], [], []>} : vector<8x144xbf16>, vector<144x512xbf16>, vector<8x512xf32> -> vector<8x512xf32>
    %c0_5 = arith.constant 0 : index
    %c0_6 = arith.constant 0 : index
    %5 = vector.load %arg5[%c0_5, %c0_6] : memref<1x512xf32, #tpu.memory_space<vmem>>, vector<1x512xf32>
    %6 = vector.broadcast %5 : vector<1x512xf32> to vector<8x512xf32>
    %7 = arith.addf %4, %6 : vector<8x512xf32>
    %8 = vector.extract_strided_slice %7 {offsets = [0, 0], sizes = [8, 128], strides = [1, 1]} : vector<8x512xf32> to vector<8x128xf32>
    %9 = arith.negf %8 : vector<8x128xf32>
    %10 = math.exp %9 : vector<8x128xf32>
    %cst_7 = arith.constant 1.000000e+00 : f32
    %11 = vector.broadcast %cst_7 : f32 to vector<8x128xf32>
    %12 = arith.addf %11, %10 : vector<8x128xf32>
    %13 = arith.divf %11, %12 : vector<8x128xf32>
    %14 = vector.extract_strided_slice %7 {offsets = [0, 128], sizes = [8, 128], strides = [1, 1]} : vector<8x512xf32> to vector<8x128xf32>
    %15 = arith.negf %14 : vector<8x128xf32>
    %16 = math.exp %15 : vector<8x128xf32>
    %cst_8 = arith.constant 1.000000e+00 : f32
    %17 = vector.broadcast %cst_8 : f32 to vector<8x128xf32>
    %18 = arith.addf %17, %16 : vector<8x128xf32>
    %19 = arith.divf %17, %18 : vector<8x128xf32>
    %20 = vector.extract_strided_slice %7 {offsets = [0, 256], sizes = [8, 128], strides = [1, 1]} : vector<8x512xf32> to vector<8x128xf32>
    %21 = math.tanh %20 : vector<8x128xf32>
    %22 = vector.extract_strided_slice %7 {offsets = [0, 384], sizes = [8, 128], strides = [1, 1]} : vector<8x512xf32> to vector<8x128xf32>
    %23 = arith.negf %22 : vector<8x128xf32>
    %24 = math.exp %23 : vector<8x128xf32>
    %cst_9 = arith.constant 1.000000e+00 : f32
    %25 = vector.broadcast %cst_9 : f32 to vector<8x128xf32>
    %26 = arith.addf %25, %24 : vector<8x128xf32>
    %27 = arith.divf %25, %26 : vector<8x128xf32>
    %28 = arith.mulf %19, %1 : vector<8x128xf32>
    %29 = arith.mulf %13, %21 : vector<8x128xf32>
    %30 = arith.addf %28, %29 : vector<8x128xf32>
    %c0_10 = arith.constant 0 : index
    %c0_11 = arith.constant 0 : index
    %31 = vector.load %arg11[%c0_10, %c0_11] : memref<8x128xf32, #tpu.memory_space<vmem>>, vector<8x128xf32>
    tpu.vector_store %arg11[%c0_10, %c0_11], %30 {strides = array<i32>} : memref<8x128xf32, #tpu.memory_space<vmem>>, vector<8x128xf32>,
    %32 = math.tanh %30 : vector<8x128xf32>
    %33 = arith.mulf %27, %32 : vector<8x128xf32>
    %c0_12 = arith.constant 0 : index
    %c0_13 = arith.constant 0 : index
    %34 = vector.load %arg6[%c0_12, %c0_13] : memref<128x128xbf16, #tpu.memory_space<vmem>>, vector<128x128xbf16>
    %c0_14 = arith.constant 0 : index
    %c0_15 = arith.constant 0 : index
    %35 = vector.load %arg7[%c0_14, %c0_15] : memref<1x128xf32, #tpu.memory_space<vmem>>, vector<1x128xf32>
    %c0_16 = arith.constant 0 : index
    %c0_17 = arith.constant 0 : index
    %36 = vector.load %arg8[%c0_16, %c0_17] : memref<128x128xbf16, #tpu.memory_space<vmem>>, vector<128x128xbf16>
    %c0_18 = arith.constant 0 : index
    %c0_19 = arith.constant 0 : index
    %37 = vector.load %arg9[%c0_18, %c0_19] : memref<1x128xf32, #tpu.memory_space<vmem>>, vector<1x128xf32>
    %c0_20 = arith.constant 0 : index
    %c0_21 = arith.constant 0 : index
    %38 = vector.load %arg3[%c0_20, %c0_21] : memref<8x1xf32, #tpu.memory_space<vmem>>, vector<8x1xf32>
    %39 = vector.shape_cast %38 : vector<8x1xf32> to vector<8x1xf32>
    %40 = vector.broadcast %39 : vector<8x1xf32> to vector<8x128xf32>
    %cst_22 = arith.constant 0.333333343 : f32
    %41 = vector.broadcast %cst_22 : f32 to vector<8x128xf32>
    %42 = arith.mulf %40, %41 : vector<8x128xf32>
    %c0_i32 = arith.constant 0 : i32
    %c3_i32 = arith.constant 3 : i32
    %43 = arith.addi %c0_i32, %c3_i32 : i32
    %c1_i32 = arith.constant 1 : i32
    %44 = scf.for %arg12 = %c0_i32 to %43 step %c1_i32 iter_args(%arg13 = %33) -> (vector<8x128xf32>)  : i32 {
      %46 = arith.truncf %arg13 : vector<8x128xf32> to vector<8x128xbf16>
      %cst_25 = arith.constant dense<0.000000e+00> : vector<8x128xf32>
      %47 = tpu.matmul %46, %34, %cst_25 {dimension_numbers = #tpu.dot_dimension_numbers<[1], [0], [0], [1], [0, 0, 1, 1], [], []>} : vector<8x128xbf16>, vector<128x128xbf16>, vector<8x128xf32> -> vector<8x128xf32>
      %48 = vector.broadcast %35 : vector<1x128xf32> to vector<8x128xf32>
      %49 = arith.addf %47, %48 : vector<8x128xf32>
      %50 = math.tanh %49 : vector<8x128xf32>
      %51 = arith.truncf %50 : vector<8x128xf32> to vector<8x128xbf16>
      %cst_26 = arith.constant dense<0.000000e+00> : vector<8x128xf32>
      %52 = tpu.matmul %51, %36, %cst_26 {dimension_numbers = #tpu.dot_dimension_numbers<[1], [0], [0], [1], [0, 0, 1, 1], [], []>} : vector<8x128xbf16>, vector<128x128xbf16>, vector<8x128xf32> -> vector<8x128xf32>
      %53 = vector.broadcast %37 : vector<1x128xf32> to vector<8x128xf32>
      %54 = arith.addf %52, %53 : vector<8x128xf32>
      %55 = arith.mulf %54, %42 : vector<8x128xf32>
      %cst_27 = arith.constant 5.000000e-01 : f32
      %56 = vector.broadcast %cst_27 : f32 to vector<8x128xf32>
      %57 = arith.mulf %55, %56 : vector<8x128xf32>
      %58 = arith.addf %arg13, %57 : vector<8x128xf32>
      %59 = arith.truncf %58 : vector<8x128xf32> to vector<8x128xbf16>
      %cst_28 = arith.constant dense<0.000000e+00> : vector<8x128xf32>
      %60 = tpu.matmul %59, %34, %cst_28 {dimension_numbers = #tpu.dot_dimension_numbers<[1], [0], [0], [1], [0, 0, 1, 1], [], []>} : vector<8x128xbf16>, vector<128x128xbf16>, vector<8x128xf32> -> vector<8x128xf32>
      %61 = vector.broadcast %35 : vector<1x128xf32> to vector<8x128xf32>
      %62 = arith.addf %60, %61 : vector<8x128xf32>
      %63 = math.tanh %62 : vector<8x128xf32>
      %64 = arith.truncf %63 : vector<8x128xf32> to vector<8x128xbf16>
      %cst_29 = arith.constant dense<0.000000e+00> : vector<8x128xf32>
      %65 = tpu.matmul %64, %36, %cst_29 {dimension_numbers = #tpu.dot_dimension_numbers<[1], [0], [0], [1], [0, 0, 1, 1], [], []>} : vector<8x128xbf16>, vector<128x128xbf16>, vector<8x128xf32> -> vector<8x128xf32>
      %66 = vector.broadcast %37 : vector<1x128xf32> to vector<8x128xf32>
      %67 = arith.addf %65, %66 : vector<8x128xf32>
      %68 = arith.mulf %67, %42 : vector<8x128xf32>
      %cst_30 = arith.constant 5.000000e-01 : f32
      %69 = vector.broadcast %cst_30 : f32 to vector<8x128xf32>
      %70 = arith.mulf %68, %69 : vector<8x128xf32>
      %71 = arith.addf %arg13, %70 : vector<8x128xf32>
      %72 = arith.truncf %71 : vector<8x128xf32> to vector<8x128xbf16>
      %cst_31 = arith.constant dense<0.000000e+00> : vector<8x128xf32>
      %73 = tpu.matmul %72, %34, %cst_31 {dimension_numbers = #tpu.dot_dimension_numbers<[1], [0], [0], [1], [0, 0, 1, 1], [], []>} : vector<8x128xbf16>, vector<128x128xbf16>, vector<8x128xf32> -> vector<8x128xf32>
      %74 = vector.broadcast %35 : vector<1x128xf32> to vector<8x128xf32>
      %75 = arith.addf %73, %74 : vector<8x128xf32>
      %76 = math.tanh %75 : vector<8x128xf32>
      %77 = arith.truncf %76 : vector<8x128xf32> to vector<8x128xbf16>
      %cst_32 = arith.constant dense<0.000000e+00> : vector<8x128xf32>
      %78 = tpu.matmul %77, %36, %cst_32 {dimension_numbers = #tpu.dot_dimension_numbers<[1], [0], [0], [1], [0, 0, 1, 1], [], []>} : vector<8x128xbf16>, vector<128x128xbf16>, vector<8x128xf32> -> vector<8x128xf32>
      %79 = vector.broadcast %37 : vector<1x128xf32> to vector<8x128xf32>
      %80 = arith.addf %78, %79 : vector<8x128xf32>
      %81 = arith.mulf %80, %42 : vector<8x128xf32>
      %82 = arith.addf %arg13, %81 : vector<8x128xf32>
      %83 = arith.truncf %82 : vector<8x128xf32> to vector<8x128xbf16>
      %cst_33 = arith.constant dense<0.000000e+00> : vector<8x128xf32>
      %84 = tpu.matmul %83, %34, %cst_33 {dimension_numbers = #tpu.dot_dimension_numbers<[1], [0], [0], [1], [0, 0, 1, 1], [], []>} : vector<8x128xbf16>, vector<128x128xbf16>, vector<8x128xf32> -> vector<8x128xf32>
      %85 = vector.broadcast %35 : vector<1x128xf32> to vector<8x128xf32>
      %86 = arith.addf %84, %85 : vector<8x128xf32>
      %87 = math.tanh %86 : vector<8x128xf32>
      %88 = arith.truncf %87 : vector<8x128xf32> to vector<8x128xbf16>
      %cst_34 = arith.constant dense<0.000000e+00> : vector<8x128xf32>
      %89 = tpu.matmul %88, %36, %cst_34 {dimension_numbers = #tpu.dot_dimension_numbers<[1], [0], [0], [1], [0, 0, 1, 1], [], []>} : vector<8x128xbf16>, vector<128x128xbf16>, vector<8x128xf32> -> vector<8x128xf32>
      %90 = vector.broadcast %37 : vector<1x128xf32> to vector<8x128xf32>
      %91 = arith.addf %89, %90 : vector<8x128xf32>
      %cst_35 = arith.constant 2.000000e+00 : f32
      %92 = vector.broadcast %cst_35 : f32 to vector<8x128xf32>
      %93 = arith.mulf %92, %67 : vector<8x128xf32>
      %94 = arith.addf %54, %93 : vector<8x128xf32>
      %cst_36 = arith.constant 2.000000e+00 : f32
      %95 = vector.broadcast %cst_36 : f32 to vector<8x128xf32>
      %96 = arith.mulf %95, %80 : vector<8x128xf32>
      %97 = arith.addf %94, %96 : vector<8x128xf32>
      %98 = arith.addf %97, %91 : vector<8x128xf32>
      %cst_37 = arith.constant 0.166666672 : f32
      %99 = vector.broadcast %cst_37 : f32 to vector<8x128xf32>
      %100 = arith.mulf %98, %99 : vector<8x128xf32>
      %101 = arith.mulf %42, %100 : vector<8x128xf32>
      %102 = arith.addf %arg13, %101 : vector<8x128xf32>
      scf.yield %102 : vector<8x128xf32>
    }
    %c0_23 = arith.constant 0 : index
    %c0_24 = arith.constant 0 : index
    %45 = vector.load %arg10[%c0_23, %c0_24] : memref<8x128xf32, #tpu.memory_space<vmem>>, vector<8x128xf32>
    tpu.vector_store %arg10[%c0_23, %c0_24], %44 {strides = array<i32>} : memref<8x128xf32, #tpu.memory_space<vmem>>, vector<8x128xf32>,
    return
  }
  func.func @transform_0(%arg0: i32) -> (i32, i32) {
    %c0_i32 = arith.constant 0 : i32
    %c0_i32_0 = arith.constant 0 : i32
    return %arg0, %c0_i32 : i32, i32
  }
  func.func @transform_1(%arg0: i32) -> (i32, i32) {
    %c0_i32 = arith.constant 0 : i32
    %c0_i32_0 = arith.constant 0 : i32
    return %arg0, %c0_i32 : i32, i32
  }
  func.func @transform_2(%arg0: i32) -> (i32, i32) {
    %c0_i32 = arith.constant 0 : i32
    %c0_i32_0 = arith.constant 0 : i32
    return %arg0, %c0_i32 : i32, i32
  }
  func.func @transform_3(%arg0: i32) -> (i32, i32) {
    %c0_i32 = arith.constant 0 : i32
    %c0_i32_0 = arith.constant 0 : i32
    %c0_i32_1 = arith.constant 0 : i32
    return %c0_i32, %c0_i32_0 : i32, i32
  }
  func.func @transform_4(%arg0: i32) -> (i32, i32) {
    %c0_i32 = arith.constant 0 : i32
    %c0_i32_0 = arith.constant 0 : i32
    %c0_i32_1 = arith.constant 0 : i32
    return %c0_i32, %c0_i32_0 : i32, i32
  }
  func.func @transform_5(%arg0: i32) -> (i32, i32) {
    %c0_i32 = arith.constant 0 : i32
    %c0_i32_0 = arith.constant 0 : i32
    %c0_i32_1 = arith.constant 0 : i32
    return %c0_i32, %c0_i32_0 : i32, i32
  }
  func.func @transform_6(%arg0: i32) -> (i32, i32) {
    %c0_i32 = arith.constant 0 : i32
    %c0_i32_0 = arith.constant 0 : i32
    %c0_i32_1 = arith.constant 0 : i32
    return %c0_i32, %c0_i32_0 : i32, i32
  }
  func.func @transform_7(%arg0: i32) -> (i32, i32) {
    %c0_i32 = arith.constant 0 : i32
    %c0_i32_0 = arith.constant 0 : i32
    %c0_i32_1 = arith.constant 0 : i32
    return %c0_i32, %c0_i32_0 : i32, i32
  }
  func.func @transform_8(%arg0: i32) -> (i32, i32) {
    %c0_i32 = arith.constant 0 : i32
    %c0_i32_0 = arith.constant 0 : i32
    %c0_i32_1 = arith.constant 0 : i32
    return %c0_i32, %c0_i32_0 : i32, i32
  }
  func.func @transform_9(%arg0: i32) -> (i32, i32) {
    %c0_i32 = arith.constant 0 : i32
    %c0_i32_0 = arith.constant 0 : i32
    return %arg0, %c0_i32 : i32, i32
  }
  func.func @transform_10(%arg0: i32) -> (i32, i32) {
    %c0_i32 = arith.constant 0 : i32
    %c0_i32_0 = arith.constant 0 : i32
    return %arg0, %c0_i32 : i32, i32
  }
}

module attributes {stable_mosaic.version = 11 : i64} {
  func.func @_odelstm_kernel(%arg0: i32, %arg1: memref<8x144xf32, #tpu.memory_space<vmem>>, %arg2: memref<8x128xf32, #tpu.memory_space<vmem>>, %arg3: memref<8x1xf32, #tpu.memory_space<vmem>>, %arg4: memref<144x512xbf16, #tpu.memory_space<vmem>>, %arg5: memref<1x512xf32, #tpu.memory_space<vmem>>, %arg6: memref<128x128xbf16, #tpu.memory_space<vmem>>, %arg7: memref<1x128xf32, #tpu.memory_space<vmem>>, %arg8: memref<128x128xbf16, #tpu.memory_space<vmem>>, %arg9: memref<1x128xf32, #tpu.memory_space<vmem>>, %arg10: memref<8x128xf32, #tpu.memory_space<vmem>>, %arg11: memref<8x128xf32, #tpu.memory_space<vmem>>) attributes {dimension_semantics = [#tpu.dimension_semantics<parallel>], iteration_bounds = array<i64: 2>, scalar_prefetch = 0 : i64, scratch_operands = 0 : i64, tpu.core_type = #tpu.core_type<tc>, window_params = [{transform_indices = @transform_0, window_bounds = array<i64: 8, 144>}, {transform_indices = @transform_1, window_bounds = array<i64: 8, 128>}, {transform_indices = @transform_2, window_bounds = array<i64: 8, 1>}, {pipeline_mode = #tpu.pipeline_mode<synchronous>, transform_indices = @transform_3, window_bounds = array<i64: 144, 512>}, {pipeline_mode = #tpu.pipeline_mode<synchronous>, transform_indices = @transform_4, window_bounds = array<i64: 1, 512>}, {pipeline_mode = #tpu.pipeline_mode<synchronous>, transform_indices = @transform_5, window_bounds = array<i64: 128, 128>}, {pipeline_mode = #tpu.pipeline_mode<synchronous>, transform_indices = @transform_6, window_bounds = array<i64: 1, 128>}, {pipeline_mode = #tpu.pipeline_mode<synchronous>, transform_indices = @transform_7, window_bounds = array<i64: 128, 128>}, {pipeline_mode = #tpu.pipeline_mode<synchronous>, transform_indices = @transform_8, window_bounds = array<i64: 1, 128>}, {transform_indices = @transform_9, window_bounds = array<i64: 8, 128>}, {transform_indices = @transform_10, window_bounds = array<i64: 8, 128>}]} {
    %c0 = arith.constant 0 : index
    %c0_0 = arith.constant 0 : index
    %0 = vector.load %arg1[%c0, %c0_0] : memref<8x144xf32, #tpu.memory_space<vmem>>, vector<8x144xf32>
    %c0_1 = arith.constant 0 : index
    %c0_2 = arith.constant 0 : index
    %1 = vector.load %arg2[%c0_1, %c0_2] : memref<8x128xf32, #tpu.memory_space<vmem>>, vector<8x128xf32>
    %2 = arith.truncf %0 : vector<8x144xf32> to vector<8x144xbf16>
    %c0_3 = arith.constant 0 : index
    %c0_4 = arith.constant 0 : index
    %3 = vector.load %arg4[%c0_3, %c0_4] : memref<144x512xbf16, #tpu.memory_space<vmem>>, vector<144x512xbf16>
    %cst = arith.constant dense<0.000000e+00> : vector<8x512xf32>
    %4 = tpu.matmul %2, %3, %cst {dimension_numbers = #tpu.dot_dimension_numbers<[1], [0], [0], [1], [0, 0, 1, 1], [], []>} : vector<8x144xbf16>, vector<144x512xbf16>, vector<8x512xf32> -> vector<8x512xf32>
    %c0_5 = arith.constant 0 : index
    %c0_6 = arith.constant 0 : index
    %5 = vector.load %arg5[%c0_5, %c0_6] : memref<1x512xf32, #tpu.memory_space<vmem>>, vector<1x512xf32>
    %6 = vector.broadcast %5 : vector<1x512xf32> to vector<8x512xf32>
    %7 = arith.addf %4, %6 : vector<8x512xf32>
    %8 = vector.extract_strided_slice %7 {offsets = [0, 0], sizes = [8, 128], strides = [1, 1]} : vector<8x512xf32> to vector<8x128xf32>
    %9 = arith.negf %8 : vector<8x128xf32>
    %10 = math.exp %9 : vector<8x128xf32>
    %cst_7 = arith.constant 1.000000e+00 : f32
    %11 = vector.broadcast %cst_7 : f32 to vector<8x128xf32>
    %12 = arith.addf %11, %10 : vector<8x128xf32>
    %13 = arith.divf %11, %12 : vector<8x128xf32>
    %14 = vector.extract_strided_slice %7 {offsets = [0, 128], sizes = [8, 128], strides = [1, 1]} : vector<8x512xf32> to vector<8x128xf32>
    %15 = arith.negf %14 : vector<8x128xf32>
    %16 = math.exp %15 : vector<8x128xf32>
    %cst_8 = arith.constant 1.000000e+00 : f32
    %17 = vector.broadcast %cst_8 : f32 to vector<8x128xf32>
    %18 = arith.addf %17, %16 : vector<8x128xf32>
    %19 = arith.divf %17, %18 : vector<8x128xf32>
    %20 = vector.extract_strided_slice %7 {offsets = [0, 256], sizes = [8, 128], strides = [1, 1]} : vector<8x512xf32> to vector<8x128xf32>
    %21 = math.tanh %20 : vector<8x128xf32>
    %22 = vector.extract_strided_slice %7 {offsets = [0, 384], sizes = [8, 128], strides = [1, 1]} : vector<8x512xf32> to vector<8x128xf32>
    %23 = arith.negf %22 : vector<8x128xf32>
    %24 = math.exp %23 : vector<8x128xf32>
    %cst_9 = arith.constant 1.000000e+00 : f32
    %25 = vector.broadcast %cst_9 : f32 to vector<8x128xf32>
    %26 = arith.addf %25, %24 : vector<8x128xf32>
    %27 = arith.divf %25, %26 : vector<8x128xf32>
    %28 = arith.mulf %19, %1 : vector<8x128xf32>
    %29 = arith.mulf %13, %21 : vector<8x128xf32>
    %30 = arith.addf %28, %29 : vector<8x128xf32>
    %c0_10 = arith.constant 0 : index
    %c0_11 = arith.constant 0 : index
    %31 = vector.load %arg11[%c0_10, %c0_11] : memref<8x128xf32, #tpu.memory_space<vmem>>, vector<8x128xf32>
    tpu.vector_store %arg11[%c0_10, %c0_11], %30 {strides = array<i32>} : memref<8x128xf32, #tpu.memory_space<vmem>>, vector<8x128xf32>,
    %32 = math.tanh %30 : vector<8x128xf32>
    %33 = arith.mulf %27, %32 : vector<8x128xf32>
    %c0_12 = arith.constant 0 : index
    %c0_13 = arith.constant 0 : index
    %34 = vector.load %arg6[%c0_12, %c0_13] : memref<128x128xbf16, #tpu.memory_space<vmem>>, vector<128x128xbf16>
    %c0_14 = arith.constant 0 : index
    %c0_15 = arith.constant 0 : index
    %35 = vector.load %arg7[%c0_14, %c0_15] : memref<1x128xf32, #tpu.memory_space<vmem>>, vector<1x128xf32>
    %c0_16 = arith.constant 0 : index
    %c0_17 = arith.constant 0 : index
    %36 = vector.load %arg8[%c0_16, %c0_17] : memref<128x128xbf16, #tpu.memory_space<vmem>>, vector<128x128xbf16>
    %c0_18 = arith.constant 0 : index
    %c0_19 = arith.constant 0 : index
    %37 = vector.load %arg9[%c0_18, %c0_19] : memref<1x128xf32, #tpu.memory_space<vmem>>, vector<1x128xf32>
    %c0_20 = arith.constant 0 : index
    %c0_21 = arith.constant 0 : index
    %38 = vector.load %arg3[%c0_20, %c0_21] : memref<8x1xf32, #tpu.memory_space<vmem>>, vector<8x1xf32>
    %39 = vector.shape_cast %38 : vector<8x1xf32> to vector<8x1xf32>
    %40 = vector.broadcast %39 : vector<8x1xf32> to vector<8x128xf32>
    %cst_22 = arith.constant 0.333333343 : f32
    %41 = vector.broadcast %cst_22 : f32 to vector<8x128xf32>
    %42 = arith.mulf %40, %41 : vector<8x128xf32>
    %c0_i32 = arith.constant 0 : i32
    %c3_i32 = arith.constant 3 : i32
    %43 = arith.addi %c0_i32, %c3_i32 : i32
    %c1_i32 = arith.constant 1 : i32
    %44 = scf.for %arg12 = %c0_i32 to %43 step %c1_i32 iter_args(%arg13 = %33) -> (vector<8x128xf32>)  : i32 {
      %46 = arith.truncf %arg13 : vector<8x128xf32> to vector<8x128xbf16>
      %cst_25 = arith.constant dense<0.000000e+00> : vector<8x128xf32>
      %47 = tpu.matmul %46, %34, %cst_25 {dimension_numbers = #tpu.dot_dimension_numbers<[1], [0], [0], [1], [0, 0, 1, 1], [], []>} : vector<8x128xbf16>, vector<128x128xbf16>, vector<8x128xf32> -> vector<8x128xf32>
      %48 = vector.broadcast %35 : vector<1x128xf32> to vector<8x128xf32>
      %49 = arith.addf %47, %48 : vector<8x128xf32>
      %50 = math.tanh %49 : vector<8x128xf32>
      %51 = arith.truncf %50 : vector<8x128xf32> to vector<8x128xbf16>
      %cst_26 = arith.constant dense<0.000000e+00> : vector<8x128xf32>
      %52 = tpu.matmul %51, %36, %cst_26 {dimension_numbers = #tpu.dot_dimension_numbers<[1], [0], [0], [1], [0, 0, 1, 1], [], []>} : vector<8x128xbf16>, vector<128x128xbf16>, vector<8x128xf32> -> vector<8x128xf32>
      %53 = vector.broadcast %37 : vector<1x128xf32> to vector<8x128xf32>
      %54 = arith.addf %52, %53 : vector<8x128xf32>
      %55 = arith.mulf %54, %42 : vector<8x128xf32>
      %cst_27 = arith.constant 5.000000e-01 : f32
      %56 = vector.broadcast %cst_27 : f32 to vector<8x128xf32>
      %57 = arith.mulf %55, %56 : vector<8x128xf32>
      %58 = arith.addf %arg13, %57 : vector<8x128xf32>
      %59 = arith.truncf %58 : vector<8x128xf32> to vector<8x128xbf16>
      %cst_28 = arith.constant dense<0.000000e+00> : vector<8x128xf32>
      %60 = tpu.matmul %59, %34, %cst_28 {dimension_numbers = #tpu.dot_dimension_numbers<[1], [0], [0], [1], [0, 0, 1, 1], [], []>} : vector<8x128xbf16>, vector<128x128xbf16>, vector<8x128xf32> -> vector<8x128xf32>
      %61 = vector.broadcast %35 : vector<1x128xf32> to vector<8x128xf32>
      %62 = arith.addf %60, %61 : vector<8x128xf32>
      %63 = math.tanh %62 : vector<8x128xf32>
      %64 = arith.truncf %63 : vector<8x128xf32> to vector<8x128xbf16>
      %cst_29 = arith.constant dense<0.000000e+00> : vector<8x128xf32>
      %65 = tpu.matmul %64, %36, %cst_29 {dimension_numbers = #tpu.dot_dimension_numbers<[1], [0], [0], [1], [0, 0, 1, 1], [], []>} : vector<8x128xbf16>, vector<128x128xbf16>, vector<8x128xf32> -> vector<8x128xf32>
      %66 = vector.broadcast %37 : vector<1x128xf32> to vector<8x128xf32>
      %67 = arith.addf %65, %66 : vector<8x128xf32>
      %68 = arith.mulf %67, %42 : vector<8x128xf32>
      %cst_30 = arith.constant 5.000000e-01 : f32
      %69 = vector.broadcast %cst_30 : f32 to vector<8x128xf32>
      %70 = arith.mulf %68, %69 : vector<8x128xf32>
      %71 = arith.addf %arg13, %70 : vector<8x128xf32>
      %72 = arith.truncf %71 : vector<8x128xf32> to vector<8x128xbf16>
      %cst_31 = arith.constant dense<0.000000e+00> : vector<8x128xf32>
      %73 = tpu.matmul %72, %34, %cst_31 {dimension_numbers = #tpu.dot_dimension_numbers<[1], [0], [0], [1], [0, 0, 1, 1], [], []>} : vector<8x128xbf16>, vector<128x128xbf16>, vector<8x128xf32> -> vector<8x128xf32>
      %74 = vector.broadcast %35 : vector<1x128xf32> to vector<8x128xf32>
      %75 = arith.addf %73, %74 : vector<8x128xf32>
      %76 = math.tanh %75 : vector<8x128xf32>
      %77 = arith.truncf %76 : vector<8x128xf32> to vector<8x128xbf16>
      %cst_32 = arith.constant dense<0.000000e+00> : vector<8x128xf32>
      %78 = tpu.matmul %77, %36, %cst_32 {dimension_numbers = #tpu.dot_dimension_numbers<[1], [0], [0], [1], [0, 0, 1, 1], [], []>} : vector<8x128xbf16>, vector<128x128xbf16>, vector<8x128xf32> -> vector<8x128xf32>
      %79 = vector.broadcast %37 : vector<1x128xf32> to vector<8x128xf32>
      %80 = arith.addf %78, %79 : vector<8x128xf32>
      %81 = arith.mulf %80, %42 : vector<8x128xf32>
      %82 = arith.addf %arg13, %81 : vector<8x128xf32>
      %83 = arith.truncf %82 : vector<8x128xf32> to vector<8x128xbf16>
      %cst_33 = arith.constant dense<0.000000e+00> : vector<8x128xf32>
      %84 = tpu.matmul %83, %34, %cst_33 {dimension_numbers = #tpu.dot_dimension_numbers<[1], [0], [0], [1], [0, 0, 1, 1], [], []>} : vector<8x128xbf16>, vector<128x128xbf16>, vector<8x128xf32> -> vector<8x128xf32>
      %85 = vector.broadcast %35 : vector<1x128xf32> to vector<8x128xf32>
      %86 = arith.addf %84, %85 : vector<8x128xf32>
      %87 = math.tanh %86 : vector<8x128xf32>
      %88 = arith.truncf %87 : vector<8x128xf32> to vector<8x128xbf16>
      %cst_34 = arith.constant dense<0.000000e+00> : vector<8x128xf32>
      %89 = tpu.matmul %88, %36, %cst_34 {dimension_numbers = #tpu.dot_dimension_numbers<[1], [0], [0], [1], [0, 0, 1, 1], [], []>} : vector<8x128xbf16>, vector<128x128xbf16>, vector<8x128xf32> -> vector<8x128xf32>
      %90 = vector.broadcast %37 : vector<1x128xf32> to vector<8x128xf32>
      %91 = arith.addf %89, %90 : vector<8x128xf32>
      %cst_35 = arith.constant 2.000000e+00 : f32
      %92 = vector.broadcast %cst_35 : f32 to vector<8x128xf32>
      %93 = arith.mulf %92, %67 : vector<8x128xf32>
      %94 = arith.addf %54, %93 : vector<8x128xf32>
      %cst_36 = arith.constant 2.000000e+00 : f32
      %95 = vector.broadcast %cst_36 : f32 to vector<8x128xf32>
      %96 = arith.mulf %95, %80 : vector<8x128xf32>
      %97 = arith.addf %94, %96 : vector<8x128xf32>
      %98 = arith.addf %97, %91 : vector<8x128xf32>
      %cst_37 = arith.constant 0.166666672 : f32
      %99 = vector.broadcast %cst_37 : f32 to vector<8x128xf32>
      %100 = arith.mulf %98, %99 : vector<8x128xf32>
      %101 = arith.mulf %42, %100 : vector<8x128xf32>
      %102 = arith.addf %arg13, %101 : vector<8x128xf32>
      scf.yield %102 : vector<8x128xf32>
    }
    %c0_23 = arith.constant 0 : index
    %c0_24 = arith.constant 0 : index
    %45 = vector.load %arg10[%c0_23, %c0_24] : memref<8x128xf32, #tpu.memory_space<vmem>>, vector<8x128xf32>
    tpu.vector_store %arg10[%c0_23, %c0_24], %44 {strides = array<i32>} : memref<8x128xf32, #tpu.memory_space<vmem>>, vector<8x128xf32>,
    return
  }
  func.func @transform_0(%arg0: i32) -> (i32, i32) {
    %c0_i32 = arith.constant 0 : i32
    %c0_i32_0 = arith.constant 0 : i32
    return %arg0, %c0_i32 : i32, i32
  }
  func.func @transform_1(%arg0: i32) -> (i32, i32) {
    %c0_i32 = arith.constant 0 : i32
    %c0_i32_0 = arith.constant 0 : i32
    return %arg0, %c0_i32 : i32, i32
  }
  func.func @transform_2(%arg0: i32) -> (i32, i32) {
    %c0_i32 = arith.constant 0 : i32
    %c0_i32_0 = arith.constant 0 : i32
    return %arg0, %c0_i32 : i32, i32
  }
  func.func @transform_3(%arg0: i32) -> (i32, i32) {
    %c0_i32 = arith.constant 0 : i32
    %c0_i32_0 = arith.constant 0 : i32
    %c0_i32_1 = arith.constant 0 : i32
    return %c0_i32, %c0_i32_0 : i32, i32
  }
  func.func @transform_4(%arg0: i32) -> (i32, i32) {
    %c0_i32 = arith.constant 0 : i32
    %c0_i32_0 = arith.constant 0 : i32
    %c0_i32_1 = arith.constant 0 : i32
    return %c0_i32, %c0_i32_0 : i32, i32
  }
  func.func @transform_5(%arg0: i32) -> (i32, i32) {
    %c0_i32 = arith.constant 0 : i32
    %c0_i32_0 = arith.constant 0 : i32
    %c0_i32_1 = arith.constant 0 : i32
    return %c0_i32, %c0_i32_0 : i32, i32
  }
  func.func @transform_6(%arg0: i32) -> (i32, i32) {
    %c0_i32 = arith.constant 0 : i32
    %c0_i32_0 = arith.constant 0 : i32
    %c0_i32_1 = arith.constant 0 : i32
    return %c0_i32, %c0_i32_0 : i32, i32
  }
  func.func @transform_7(%arg0: i32) -> (i32, i32) {
    %c0_i32 = arith.constant 0 : i32
    %c0_i32_0 = arith.constant 0 : i32
    %c0_i32_1 = arith.constant 0 : i32
    return %c0_i32, %c0_i32_0 : i32, i32
  }
  func.func @transform_8(%arg0: i32) -> (i32, i32) {
    %c0_i32 = arith.constant 0 : i32
    %c0_i32_0 = arith.constant 0 : i32
    %c0_i32_1 = arith.constant 0 : i32
    return %c0_i32, %c0_i32_0 : i32, i32
  }
  func.func @transform_9(%arg0: i32) -> (i32, i32) {
    %c0_i32 = arith.constant 0 : i32
    %c0_i32_0 = arith.constant 0 : i32
    return %arg0, %c0_i32 : i32, i32
  }
  func.func @transform_10(%arg0: i32) -> (i32, i32) {
    %c0_i32 = arith.constant 0 : i32
    %c0_i32_0 = arith.constant 0 : i32
    return %arg0, %c0_i32 : i32, i32
  }
}

</mosaic_0001>

<bundles_post_ra>
// kernel: tpu_custom_call.1
= control target key start
LH: loop header
LB: loop body
LE: loop exit
PB: predicated region body
PF: predicated region fallthrough
CT: control target
= control target key end

     0   :  { %s2867_s0 = inlined_call_operand.hbm [shape: f32[16,144], index: 0, kind: input, shape index: {}]   ;;  %s2868_s1 = inlined_call_operand.vmem [shape: f32[16,128], index: 1, kind: input, shape index: {}]   ;;  %s2869_s2 = inlined_call_operand.vmem [shape: f32[16,1], index: 2, kind: input, shape index: {}]   ;;  %s2870_s3 = inlined_call_operand.hbm [shape: bf16[144,512], index: 3, kind: input, shape index: {}]   ;;  %s2871_s4 = inlined_call_operand.vmem [shape: f32[1,512], index: 4, kind: input, shape index: {}]   ;;  %s2872_s5 = inlined_call_operand.hbm [shape: bf16[128,128], index: 5, kind: input, shape index: {}]   ;;  %s2873_s6 = inlined_call_operand.vmem [shape: f32[1,128], index: 6, kind: input, shape index: {}]   ;;  %s2874_s7 = inlined_call_operand.hbm [shape: bf16[128,128], index: 7, kind: input, shape index: {}]   ;;  %s2875_s8 = inlined_call_operand.vmem [shape: f32[1,128], index: 8, kind: input, shape index: {}]   ;;  %s2876_s9 = inlined_call_operand.hbm [shape: f32[16,128], index: 9, kind: output, shape index: {0}]   ;;  %s2877_s10 = inlined_call_operand.hbm [shape: f32[16,128], index: 10, kind: output, shape index: {1}]  }
   0x1   :  { %2883 = sst [smem:[#allocation20_spill]] %s2870_s3 }
   0x2   :  { %2884 = sst [smem:[#allocation21_spill]] %s2872_s5 }
   0x3   :  { %2885 = sst [smem:[#allocation22_spill]] %s2874_s7 }
   0x4   :  { %16 = vsyncpa [#allocation3], 0 }
   0x5   :  { %18 = vsyncpa [#allocation3 + $0x1], 0 }
   0x6   :  { %19 = vsyncpa [#allocation6], 0 }
   0x7   :  { %20 = vsyncpa [#allocation9], 0 }
   0x8   :  { %21 = vsyncpa [#allocation4], 0 }
   0x9   :  { %23 = vsyncpa [#allocation4 + $0x1], 0 }
   0xa   :  { %24 = vsyncpa [#allocation12], 0 }
   0xb   :  { %26 = vsyncpa [#allocation12 + $0x1], 0  ;;  %s2314_s13 = smov 0   ;;  %s2316_s14 = smov 0  }
   0xc   :  { %s2318_s15 = smov 0   ;;  %s2320_s16 = smov 0  }
   0xd LB: > { %2886 = sst [smem:[#allocation18_spill]] %s2232_s15  ;;  %s2335_s17 = sadd.s32 4294967295, %s2236_s16   ;;  %s2236_s16 = sphi %s2320_s16, %s2912_s16   ;;  %s2232_s15 = sphi %s2318_s15, %s2909_s15   ;;  %s2228_s14 = sphi %s2316_s14, %s2911_s14   ;;  %s2224_s13 = sphi %s2314_s13, %s2910_s13  }
   0xe   : > { %s1520_s18 = sadd.s32 4294967294, %s2236_s16   ;;  %p52_p0 = scmp.ne.s32.totalorder %s2228_s14, %s2224_s13 }
   0xf   : > { %p2878_p1 = scmp.eq.s32.totalorder %s2335_s17, 0  ;;  %p260_p3 = scmp.eq.s32.totalorder %s1520_s18, 1 }
  0x10   : > { %p1521_p5 = scmp.ge.s32.totalorder %s2236_s16, 1  ;;  %p293_p7 = scmp.lt.s32.totalorder %s2236_s16, 3 }
  0x11   : > { %p2344_p4 = por %p2878_p1, %p52_p0  ;;  %p2349_p6 = por %p260_p3, %p52_p0 }
  0x12   : > { %p2354_p8 = pnand %p1521_p5, %p293_p7  ;;  %s2246_s22 = smov [#allocation5]  }
  0x13   : > { %s2887_s19 = scalar_select %p2344_p4, 1, 0 }
  0x14   : > { %s2888_s20 = scalar_select %p2349_p6, 1, 0 }
  0x15   : > { %s2889_s21 = scalar_select %p2354_p8, 1, 0 }
  0x16   : > { %s305_s23 = sshll.u32 %s2246_s22, 4  ;;  %p1854_p9 = pneg %p2354_p8  ;;  %s306_s23 = int_to_ptr.vmem [resolvable:$true] %s305_s23 }
  0x17   : > { %s2247_s25 = smov [#allocation7]   ;;  %s2031_s27 = scalar_lea.vmem %s306_s23, 4608 }
  0x18   : > { %p2363_p11 = pnand %p1854_p9, %p2878_p1  ;;  %s321_s26 = sshll.u32 %s2247_s25, 4  ;;  %s322_s26 = int_to_ptr.vmem [resolvable:$true] %s321_s26 }
  0x19   : > { %p2032_p13 = scmp.ne.s32.totalorder %s306_s23, %s2031_s27  ;;  %p2039_p5 = scmp.lt.s32.totalorder %s306_s23, %s306_s23 }
  0x1a   : > { %p2022_p12 = pneg %p2363_p11  ;;  %p2040_p7 = scmp.lt.s32.totalorder %s2031_s27, %s2031_s27 }
  0x1c   : > { %p2034_p0 = pnand %p2032_p13, %p2022_p12  ;;  %p2041_p10 = por %p2040_p7, %p2039_p5 }
  0x1e   : > { %p2035_p3 = pneg %p2034_p0 }
  0x20   : > { %p2042_p9 = pnand %p2041_p10, %p2035_p3 }
  0x22   : > { %2045 = shalt.err (!%p2042_p9)
}
  0x23   : > { %s2248_s28 = smov 256   ;;  %s2249_s29 = smov 16  }
  0x24   : > { %s2891_s3 = sld [smem:[#allocation20_spill]]  ;;  %s2057_s12 = scalar_lea.vmem %s322_s26, 1024 }
  0x25   : > { %p2058_p1 = scmp.ne.s32.totalorder %s322_s26, %s2057_s12  ;;  %p2065_p2 = scmp.lt.s32.totalorder %s322_s26, %s322_s26 }
  0x26   : > { %p2066_p6 = scmp.lt.s32.totalorder %s2057_s12, %s2057_s12 }
  0x27   : > { %p2060_p13 = pnand %p2058_p1, %p2022_p12 }
  0x28   : > { %p2067_p5 = por %p2066_p6, %p2065_p2 }
  0x29   : > { %p2061_p0 = pneg %p2060_p13 }
  0x2a   : > { %1857 = dma.hbm_to_vmem [thread:$0]  (!%p2363_p11), %s2891_s3, 4608, %s306_s23, [#allocation6], %s2248_s28, %s2248_s28, %s2249_s29  }
  0x2b   : > { %p2068_p10 = pnand %p2067_p5, %p2061_p0 }
  0x2d   : > { %2071 = shalt.err (!%p2068_p10)
}
  0x2e   : > { %s2250_s18 = smov 64   ;;  %s2251_s22 = smov 4  }
  0x2f   : > { %s2892_s5 = sld [smem:[#allocation21_spill]]  ;;  %s2252_s23 = smov [#allocation8]  }
  0x30   : > { %s337_s28 = sshll.u32 %s2252_s23, 4  ;;  %s2386_s29 = sadd.s32 1, %s2236_s16   ;;  %s338_s28 = int_to_ptr.vmem [resolvable:$true] %s337_s28 }
  0x31   : > { %s2083_s30 = scalar_lea.vmem %s338_s28, 1024  ;;  %p2091_p3 = scmp.lt.s32.totalorder %s338_s28, %s338_s28 }
  0x32   : > { %p2084_p1 = scmp.ne.s32.totalorder %s338_s28, %s2083_s30  ;;  %p2092_p7 = scmp.lt.s32.totalorder %s2083_s30, %s2083_s30 }
  0x34   : > { %p2086_p2 = pnand %p2084_p1, %p2022_p12  ;;  %p2093_p9 = por %p2092_p7, %p2091_p3 }
  0x35   : > { %1860 = dma.hbm_to_vmem [thread:$0]  (!%p2363_p11), %s2892_s5, 1024, %s322_s26, [#allocation6], %s2250_s18, %s2250_s18, %s2251_s22  }
  0x36   : > { %p2087_p6 = pneg %p2086_p2 }
  0x38   : > { %p2094_p13 = pnand %p2093_p9, %p2087_p6 }
  0x3a   : > { %2097 = shalt.err (!%p2094_p13)
}
  0x3b   : > { %s2893_s7 = sld [smem:[#allocation22_spill]]  ;;  %s36_s12 = ssub.s32 %s2236_s16, %s2386_s29 }
  0x3c   : > { %s39_s25 = sadd.s32 1, %s2232_s15  ;;  %p37_p12 = scmp.eq.s32.totalorder %s36_s12, 0 }
  0x3d   : > { %p46_p0 = scmp.ne.s32.totalorder %s2232_s15, %s2228_s14  ;;  %p47_p5 = scmp.eq.s32.totalorder %s2236_s16, 0 }
  0x3e   : > { %p1878_p10 = scmp.lt.s32.totalorder %s2236_s16, 2  ;;  %p2895_p2 = scmp.eq.s32.totalorder %s2335_s17, 1 }
  0x3f   : > { %s2404_s24 = scalar_select %p37_p12, %s2232_s15, %s39_s25  }
  0x40   : > { %p48_p1 = por %p47_p5, %p46_p0  ;;  %p2408_p6 = por %p2895_p2, %p46_p0 }
  0x41   : > { %1863 = dma.hbm_to_vmem [thread:$0]  (!%p2363_p11), %s2893_s7, 1024, %s338_s28, [#allocation9], %s2250_s18, %s2250_s18, %s2251_s22  }
  0x42   : > { %2894 = sst [smem:[#allocation19_spill]] %s2404_s24  ;;  %s354_s23 = sand.u32 1, %s2232_s15  }
  0x43   : > { %s2896_s27 = scalar_select %p2408_p6, 1, 0 }
  0x44   : > { %s1603_s30 = sshll.u32 %s2236_s16, 8  ;;  %s1526_s11 = sshll.u32 %s354_s23, 4 }
  0x45   : > { %s2417_s18 = scalar_lea.hbm %s2867_s0, %s1603_s30  ;;  %s358_s22 = scalar_lea.vmem [#allocation2], %s1526_s11 }
  0x46   : > { %s366_s28 = sshll.u32 %s358_s22, 4  ;;  %p2419_p11 = pnand %p1878_p10, %p48_p1  ;;  %s367_s28 = int_to_ptr.vmem [resolvable:$true] %s366_s28 }
  0x47   : > { %s355_s25 = scalar_lea.sflag [#allocation3], %s354_s23  ;;  %s2098_s5 = scalar_lea.hbm %s2417_s18, 256 }
  0x48   : > { %p2099_p3 = scmp.ne.s32.totalorder %s2417_s18, %s2098_s5  ;;  %p2100_p7 = pneg %p2419_p11 }
  0x49   : > { %s2103_s26 = scalar_lea.hbm %s2867_s0, 512  ;;  %p2104_p12 = scmp.lt.s32.totalorder %s2417_s18, %s2867_s0 }
  0x4a   : > { %p2101_p9 = pnand %p2100_p7, %p2099_p3  ;;  %p2105_p0 = scmp.lt.s32.totalorder %s2103_s26, %s2098_s5 }
  0x4c   : > { %p2102_p13 = pneg %p2101_p9  ;;  %p2106_p5 = por %p2105_p0, %p2104_p12 }
  0x4e   : > { %p2107_p10 = pnand %p2106_p5, %p2102_p13 }
  0x50   : > { %2110 = shalt.err (!%p2107_p10)
}
  0x51   : > { %s2111_s22 = scalar_lea.vmem %s367_s28, 256  ;;  %s2253_s23 = smov [#allocation2]  }
  0x52   : > { %p2112_p1 = scmp.ne.s32.totalorder %s367_s28, %s2111_s22  ;;  %s2116_s24 = sshll.u32 %s2253_s23, 4  ;;  %s2117_s24 = int_to_ptr.vmem [resolvable:$false] %s2116_s24 }
  0x53   : > { %s2118_s15 = scalar_lea.vmem %s2117_s24, 512  ;;  %p2119_p3 = scmp.lt.s32.totalorder %s367_s28, %s2117_s24 }
  0x54   : > { %p2114_p2 = pnand %p2112_p1, %p2100_p7  ;;  %p2120_p9 = scmp.lt.s32.totalorder %s2118_s15, %s2111_s22 }
  0x56   : > { %p2115_p6 = pneg %p2114_p2  ;;  %p2121_p4 = por %p2120_p9, %p2119_p3 }
  0x58   : > { %p2122_p8 = pnand %p2121_p4, %p2115_p6 }
  0x5a   : > { %2125 = shalt.err (!%p2122_p8)
}
  0x5b   : > { %1867 = dma.hbm_to_vmem [thread:$0]  (!%p2419_p11), %s2417_s18, 256, %s367_s28, %s355_s25  }
  0x5c   : > { %p2898_p13 = scmp.ne.s32.totalorder %s2889_s21, 0 }
  0x5d   : > { %s2440_s5 = sand.u32 (!%p2898_p13), 1, %s2228_s14   ;;  %p2899_p7 = scmp.ne.s32.totalorder (!%p2898_p13), %s2887_s19, 0 }
  0x5e   : > { %389 = sbr.rel (%p2898_p13) target bundleno = 2126 (0x84e), region = 56  ;;  %s1530_s7 = sshll.u32 (!%p2898_p13), %s2440_s5, 4 }
  0x5f   : > { %s392_s3 = scalar_lea.sflag (!%p2898_p13), [#allocation3], %s2440_s5  ;;  %s2444_s24 = scalar_lea.vmem (!%p2898_p13), [#allocation2], %s1530_s7 }
  0x63   : > { %2203 = dma.done.wait (%p2899_p7), %s392_s3, 256  }
  0x64   : > { %2205 = vsyncadd (%p2899_p7), %s392_s3, 4294967040  ;;  %p2900_p4 = scmp.eq.s32.totalorder %s2335_s17, 0 }
  0x66   : > { %2207 = dma.done.wait (%p2900_p4), [#allocation6], 5632   ;;  %p2901_p8 = pmov %p2900_p4 }
  0x67   : > { %p2902_p6 = pmov %p2900_p4 }
  0x68   : > { %2209 = vsyncadd (%p2901_p8), [#allocation6], 4294961664 }
  0x69   : > { %2211 = dma.done.wait (%p2902_p6), [#allocation9], 1024   ;;  %p2903_p11 = pmov %p2900_p4 }
  0x6a   : > { %v2254_v0 = vmov 0   ;;  %v2458_v1 = vld [vmem:[#allocation7] sm:$0xf]  ;;  %v2460_v2 = vld [vmem:[#allocation7 + $0x4] sm:$0xf]  ;;  %p457_p12 = scmp.lt.s32.totalorder %s2335_s17, 1 }
  0x6b   : > { %2213 = vsyncadd (%p2903_p11), [#allocation9], 4294966272  ;;  %1941 = vset.pattern.permute.xlu0 %v2254_v0  ;;  %v2462_v3 = vld [vmem:[#allocation7 + $0x8] sm:$0xf]  ;;  %v2464_v4 = vld [vmem:[#allocation7 + $0xc] sm:$0xf] }
  0x6c   : > { %v2466_v5 = vld [vmem:[#allocation7 + $0x10] sm:$0xf]  ;;  %v2468_v6 = vld [vmem:[#allocation7 + $0x14] sm:$0xf]  ;;  %v2470_v7 = vld [vmem:[#allocation7 + $0x18] sm:$0xf] }
  0x6d   : > { %v2472_v8 = vld [vmem:[#allocation7 + $0x1c] sm:$0xf]  ;;  %v2474_v9 = vld [vmem:[#allocation7 + $0x20] sm:$0xf]  ;;  %v2476_v10 = vld [vmem:[#allocation7 + $0x24] sm:$0xf] }
  0x6e   : > { %v2478_v11 = vld [vmem:[#allocation7 + $0x28] sm:$0xf]  ;;  %v2480_v12 = vld [vmem:[#allocation7 + $0x2c] sm:$0xf]  ;;  %v2482_v13 = vld [vmem:[#allocation7 + $0x30] sm:$0xf] }
  0x6f   : > { %v2484_v14 = vld [vmem:[#allocation7 + $0x34] sm:$0xf]  ;;  %v2486_v15 = vld [vmem:[#allocation7 + $0x38] sm:$0xf]  ;;  %v2488_v16 = vld [vmem:[#allocation7 + $0x3c] sm:$0xf] }
  0x70   : > { %v2493_v17 = vld [vmem:[%s2873_s6] ss:$0 sm:$0xff]  ;;  %v2497_v19 = vld [vmem:[#allocation8 + $0x4] sm:$0xf]  ;;  %v2499_v20 = vld [vmem:[#allocation8 + $0x8] sm:$0xf] }
  0x71   : > { %v2495_v18 = vld [vmem:[#allocation8] sm:$0xf]  ;;  %v2501_v21 = vld [vmem:[#allocation8 + $0xc] sm:$0xf]  ;;  %v2503_v22 = vld [vmem:[#allocation8 + $0x10] sm:$0xf] }
  0x72   : > { %v2505_v23 = vld [vmem:[#allocation8 + $0x14] sm:$0xf]  ;;  %v2507_v24 = vld [vmem:[#allocation8 + $0x18] sm:$0xf]  ;;  %v2509_v25 = vld [vmem:[#allocation8 + $0x1c] sm:$0xf] }
  0x73   : > { %v2511_v26 = vld [vmem:[#allocation8 + $0x20] sm:$0xf]  ;;  %v2513_v27 = vld [vmem:[#allocation8 + $0x24] sm:$0xf]  ;;  %v2515_v28 = vld [vmem:[#allocation8 + $0x28] sm:$0xf] }
  0x74   : > { %v2517_v29 = vld [vmem:[#allocation8 + $0x2c] sm:$0xf]  ;;  %v2519_v30 = vld [vmem:[#allocation8 + $0x30] sm:$0xf]  ;;  %v2521_v31 = vld [vmem:[#allocation8 + $0x34] sm:$0xf] }
  0x75   : > { %v2523_v32 = vld [vmem:[#allocation8 + $0x38] sm:$0xf]  ;;  %v2525_v33 = vld [vmem:[#allocation8 + $0x3c] sm:$0xf]  ;;  %v2530_v34 = vld [vmem:[%s2875_s8] ss:$0 sm:$0xff] }
  0x76   : > { %v1942_v35 = vld [vmem:[#allocation5 + $0xe4] ss:$16 sps:$4 sm:$0xff]   ;;  %v1944_v36 = vld [vmem:[#allocation5 + $0xe0] ss:$16 sps:$4 sm:$0xff]   ;;  %v1953_v40 = vld [vmem:[#allocation5 + $0xec] ss:$16 sps:$4 sm:$0xff]  }
  0x77   : > { %v1945_v37 = vld [vmem:[#allocation5 + $0xc4] ss:$16 sps:$4 sm:$0xff]   ;;  %713 = vmatprep.subr.bf16.mxu0 %v1942_v35  ;;  %v1947_v38 = vld [vmem:[#allocation5 + $0xc0] ss:$16 sps:$4 sm:$0xff]   ;;  %v1956_v41 = vld [vmem:[#allocation5 + $0xe8] ss:$16 sps:$4 sm:$0xff]   ;;  %754 = vmatprep.subr.bf16.mxu1 %v1953_v40 }
  0x78   : > { %714 = vmatpush1.bf16.msra.mxu0 %v1944_v36  ;;  %v1948_v39 = vld [vmem:[#allocation5 + $0xa4] ss:$16 sps:$4 sm:$0xff]   ;;  %v1950_v42 = vld [vmem:[#allocation5 + $0xa0] ss:$16 sps:$4 sm:$0xff]   ;;  %v1959_v43 = vld [vmem:[#allocation5 + $0xcc] ss:$16 sps:$4 sm:$0xff]   ;;  %755 = vmatpush1.bf16.msra.mxu1 %v1956_v41 }
  0x79   : > { %715 = vmatprep.subr.bf16.mxu0 %v1945_v37  ;;  %v1951_v44 = vld [vmem:[#allocation5 + $0x84] ss:$16 sps:$4 sm:$0xff]   ;;  %v1962_v45 = vld [vmem:[#allocation5 + $0xc8] ss:$16 sps:$4 sm:$0xff]   ;;  %756 = vmatprep.subr.bf16.mxu1 %v1959_v43  ;;  %v1955_v46 = vld [vmem:[#allocation5 + $0x80] ss:$16 sps:$4 sm:$0xff]  }
  0x7a   : > { %v1965_v47 = vld [vmem:[#allocation5 + $0xac] ss:$16 sps:$4 sm:$0xff]   ;;  %v1957_v48 = vld [vmem:[#allocation5 + $0x64] ss:$16 sps:$4 sm:$0xff]   ;;  %v1968_v49 = vld [vmem:[#allocation5 + $0xa8] ss:$16 sps:$4 sm:$0xff]  }
  0x7b   : > { %v1971_v50 = vld [vmem:[#allocation5 + $0x8c] ss:$16 sps:$4 sm:$0xff]   ;;  %s2534_s28 = scalar_select %p457_p12, %s2335_s17, 1  ;;  %v1961_v51 = vld [vmem:[#allocation5 + $0x60] ss:$16 sps:$4 sm:$0xff]   ;;  %vm709_vm0 = vcmask 130048  }
  0x7c   : > { %716 = vmatpush1.bf16.msra.mxu0 %v1947_v38  ;;  %757 = vmatpush1.bf16.msra.mxu1 %v1962_v45  ;;  %v1963_v52 = vld [vmem:[#allocation5 + $0x44] ss:$16 sps:$4 sm:$0xff]   ;;  %v1974_v53 = vld [vmem:[#allocation5 + $0x88] ss:$16 sps:$4 sm:$0xff]   ;;  %v1977_v54 = vld [vmem:[#allocation5 + $0x6c] ss:$16 sps:$4 sm:$0xff]  }
  0x7d   : > { %717 = vmatprep.subr.bf16.mxu0 %v1948_v39  ;;  %758 = vmatprep.subr.bf16.mxu1 %v1965_v47  ;;  %s1536_s12 = sshll.u32 %s2534_s28, 3  ;;  %v1967_v55 = vld [vmem:[#allocation5 + $0x40] ss:$16 sps:$4 sm:$0xff]   ;;  %v1969_v56 = vld [vmem:[#allocation5 + $0x24] ss:$16 sps:$4 sm:$0xff]   ;;  %v467_v57 = vld [vmem:[%s2444_s24 + $0x8] sm:$0xff] }
  0x7e   : > { %v1980_v58 = vld [vmem:[#allocation5 + $0x68] ss:$16 sps:$4 sm:$0xff]   ;;  %v470_v59 = vpack.c.bf16 %v467_v57, %v467_v57  ;;  %v1983_v60 = vld [vmem:[#allocation5 + $0x4c] ss:$16 sps:$4 sm:$0xff]   ;;  %s464_s26 = scalar_lea.vmem %s2869_s2, %s1536_s12  ;;  %v1973_v61 = vld [vmem:[#allocation5 + $0x20] ss:$16 sps:$4 sm:$0xff]  }
  0x7f   : > { %v1975_v62 = vld [vmem:[#allocation5 + $0x4] ss:$16 sps:$4 sm:$0xff]   ;;  %v1986_v63 = vld [vmem:[#allocation5 + $0x48] ss:$16 sps:$4 sm:$0xff]   ;;  %v1987_v35 = vld [vmem:[#allocation5 + $0x2c] ss:$16 sps:$4 sm:$0xff]  }
  0x80   : > { %718 = vmatpush1.bf16.msra.mxu0 %v1950_v42  ;;  %759 = vmatpush1.bf16.msra.mxu1 %v1968_v49  ;;  %v854_v0 = vld [vmem:[%s464_s26] sm:$0xff]  ;;  %v1989_v38 = vld [vmem:[#allocation5 + $0x28] ss:$16 sps:$4 sm:$0xff]   ;;  %v1990_v39 = vld [vmem:[#allocation5 + $0xc] ss:$16 sps:$4 sm:$0xff]   ;;  %s1534_s11 = sshll.u32 %s2440_s5, 3 }
  0x81   : > { %719 = vmatprep.subr.bf16.mxu0 %v1951_v44  ;;  %760 = vmatprep.subr.bf16.mxu1 %v1971_v50  ;;  %v1979_v36 = vld [vmem:[#allocation5] ss:$16 sps:$4 sm:$0xff]   ;;  %v1981_v37 = vld [vmem:[#allocation5 + $0x104] ss:$16 sps:$4 sm:$0xff]   ;;  %v1992_v42 = vld [vmem:[#allocation5 + $0x8] ss:$16 sps:$4 sm:$0xff]  }
  0x82   : > { %1574 = vmatprep.mubr.msk.bf16.mxu0 %vm709_vm0, %v470_v59  ;;  %1575 = vmatprep.mubr.msk.bf16.mxu1 %vm709_vm0, %v470_v59  ;;  %v1985_v40 = vld [vmem:[#allocation5 + $0x100] ss:$16 sps:$4 sm:$0xff]   ;;  %v1993_v43 = vld [vmem:[#allocation5 + $0x10c] ss:$16 sps:$4 sm:$0xff]   ;;  %v1995_v45 = vld [vmem:[#allocation5 + $0x108] ss:$16 sps:$4 sm:$0xff]  }
  0x83   : > { %857 = vperm.xlu0 %1941, %v854_v0   ;;  %v466_v41 = vld [vmem:[%s2444_s24] sm:$0xff]  ;;  %s460_s24 = scalar_lea.vmem %s2868_s1, %s1536_s12  ;;  %s2557_s15 = scalar_lea.vmem [#allocation11], %s1534_s11 }
  0x84   : > { %720 = vmatpush1.bf16.msra.mxu0 %v1955_v46  ;;  %761 = vmatpush1.bf16.msra.mxu1 %v1974_v53  ;;  %v469_v44 = vpack.c.bf16 %v466_v41, %v466_v41  ;;  %s2562_s19 = scalar_lea.vmem [#allocation10], %s1534_s11  ;;  %s2566_s21 = smov 0  }
  0x85   : > { %721 = vmatprep.subr.bf16.mxu0 %v1957_v48  ;;  %762 = vmatprep.subr.bf16.mxu1 %v1977_v54  ;;  %v509_v48 = vlaneseq }
  0x87   : > { %v510_v49 = vshrl.u32 %v509_v48, 7 }
  0x88   : > { %722 = vmatpush1.bf16.msra.mxu0 %v1961_v51  ;;  %763 = vmatpush1.bf16.msra.mxu1 %v1980_v58  ;;  %v507_v51 = vld [vmem:[%s2871_s4] sm:$0xf] }
  0x89   : > { %723 = vmatprep.subr.bf16.mxu0 %v1963_v52  ;;  %764 = vmatprep.subr.bf16.mxu1 %v1983_v60  ;;  %v511_v50 = vsub.s32 0, %v510_v49  ;;  %v515_v52 = vsub.s32 1, %v510_v49 }
  0x8b   : > { %v512_v53 = vrot.slane %v507_v51, %v511_v50  ;;  %v516_v54 = vrot.slane %v507_v51, %v515_v52  ;;  %v468_v52 = vld [vmem:[%s460_s24] sm:$0xff] }
  0x8c   : > { %724 = vmatpush1.bf16.msra.mxu0 %v1967_v55  ;;  %765 = vmatpush1.bf16.msra.mxu1 %v1986_v63 }
  0x8d   : > { %725 = vmatprep.subr.bf16.mxu0 %v1969_v56  ;;  %766 = vmatprep.subr.bf16.mxu1 %v1987_v35  ;;  %v519_v35 = vsub.s32 2, %v510_v49 }
  0x90   : > { %726 = vmatpush1.bf16.msra.mxu0 %v1973_v61  ;;  %767 = vmatpush1.bf16.msra.mxu1 %v1989_v38  ;;  %v523_v61 = vsub.s32 3, %v510_v49 }
  0x91   : > { %727 = vmatprep.subr.bf16.mxu0 %v1975_v62  ;;  %768 = vmatprep.subr.bf16.mxu1 %v1990_v39  ;;  %v520_v39 = vrot.slane %v507_v51, %v519_v35 }
  0x94   : > { %728 = vmatpush1.bf16.msra.mxu0 %v1979_v36  ;;  %769 = vmatpush1.bf16.msra.mxu1 %v1992_v42 }
  0x95   : > { %743 = vmatprep.subr.bf16.mxu0 %v1981_v37  ;;  %784 = vmatprep.subr.bf16.mxu1 %v1993_v43  ;;  %v524_v37 = vrot.slane %v507_v51, %v523_v61 }
  0x98   : > { %744 = vmatpush2.bf16.msra.mxu0 %v1985_v40  ;;  %785 = vmatpush2.bf16.msra.mxu1 %v1995_v45 }
  0x9b   : > { %746 = vmatmul.mubr.bf16.vlgmr.msra.gmra.mxu0 %v469_v44  ;;  %787 = vmatmul.mubr.bf16.vlgmr.msra.gmra.mxu1 %v469_v44 }
  0xfe   : > { %v858_v46 = vpop.permute.xlu0 %857 }
  0xff   : > { %v2545_v47 = vmul.f32 0.33333334, %v858_v46 }
 0x15b   : > { %v747_v55 = vpop.f32.mrf.mxu0  ;;  %v788_v63 = vpop.f32.mrf.mxu1 }
 0x15c   : > { %v748_v56 = vadd.f32 %v747_v55, %v512_v53  ;;  %v789_v42 = vadd.f32 %v788_v63, %v520_v39 }
 0x15d   : > { %v749_v57 = vpop.f32.mrf.mxu0  ;;  %v790_v36 = vpop.f32.mrf.mxu1 }
 0x15e   : > { %v1576_v58 = vmul.f32 -1.442695, %v748_v56  ;;  %v750_v59 = vadd.f32 %v749_v57, %v516_v54  ;;  %v791_v41 = vadd.f32 %v790_v36, %v524_v37 }
 0x15f   : > { %v751_v60 = vpop.f32.mrf.mxu0  ;;  %v792_v38 = vpop.f32.mrf.mxu1 }
 0x160   : > { %1996 = vpow2.f32 %v1576_v58  ;;  %v1577_v62 = vmul.f32 -1.442695, %v750_v59  ;;  %v1578_v43 = vmul.f32 -1.442695, %v791_v41 }
 0x161   : > { %v752_v0 = vpop.f32.mrf.mxu0  ;;  %v793_v40 = vpop.f32.mrf.mxu1 }
 0x162   : > { %1998 = vpow2.f32 %v1577_v62 }
 0x163   : > { %2000 = vtanh.f32 %v789_v42 }
 0x164   : > { %2002 = vpow2.f32 %v1578_v43 }
 0x16d   : > { %v1997_v44 = vpop.eup %1996 }
 0x16e   : > { %v798_v45 = vadd.f32 1.0, %v1997_v44 }
 0x16f   : > { %v1999_v46 = vpop.eup %1998 }
 0x170   : > { %2004 = vrcp.f32 %v798_v45  ;;  %v804_v48 = vadd.f32 1.0, %v1999_v46  ;;  %v2001_v49 = vpop.eup %2000 }
 0x171   : > { %v2003_v50 = vpop.eup %2002 }
 0x172   : > { %2006 = vrcp.f32 %v804_v48  ;;  %v811_v54 = vadd.f32 1.0, %v2003_v50 }
 0x174   : > { %2008 = vrcp.f32 %v811_v54 }
 0x17d   : > { %v2005_v51 = vpop.eup %2004 }
 0x17e   : > { %v815_v56 = vmul.f32 %v2005_v51, %v2001_v49 }
 0x17f   : > { %v2007_v53 = vpop.eup %2006 }
 0x180   : > { %v814_v55 = vmul.f32 %v2007_v53, %v468_v52 }
 0x181   : > { %v2009_v58 = vpop.eup %2008 }
 0x182   : > { %v816_v57 = vadd.f32 %v815_v56, %v814_v55 }
 0x184   : > { %817 = vst [vmem:[%s2557_s15] sm:$0xff] %v816_v57  ;;  %2010 = vtanh.f32 %v816_v57 }
 0x191   : > { %v2011_v59 = vpop.eup %2010 }
 0x192   : > { %v819_v60 = vmul.f32 %v2011_v59, %v2009_v58  }
 0x193 LB: >> { %v2576_v61 = vcombine.low %v2486_v15, %v2488_v16  ;;  %v2255_v62 = vmov 0.0   ;;  %v2582_v63 = vcombine.low %v2482_v13, %v2484_v14  ;;  %v2587_v0 = vcombine.low %v2523_v32, %v2525_v33  ;;  %s866_s21 = sadd.s32 1, %s2244_s21   ;;  %s2244_s21 = sphi %s2566_s21, %s866_s21   ;;  %v2240_v60 = vphi %v819_v60, %v2904_v60  }
 0x194   : >> { %1676 = vmatprep.subr.bf16.mxu0 %v2255_v62  ;;  %1696 = vmatprep.subr.bf16.mxu1 %v2255_v62  ;;  %vm2256_vm1 = vmmov 0   ;;  %v2595_v35 = vcombine.low %v2519_v30, %v2521_v31  ;;  %v2603_v36 = vcombine.low %v2478_v11, %v2480_v12  ;;  %v2609_v37 = vcombine.low %v2515_v28, %v2517_v29  ;;  %p863_p0 = scmp.ge.s32.totalorder %s866_s21, 3  }
 0x195   : >> { %1677 = vmatpush3.bf16.msra.mxu0 %v2576_v61  ;;  %1692 = vmatprep.mubr.msk.bf16.mxu0 %vm2256_vm1, %v2255_v62  ;;  %v2615_v38 = vcombine.low %v2474_v9, %v2476_v10  ;;  %v2623_v39 = vcombine.low %v2470_v7, %v2472_v8  ;;  %v2629_v40 = vcombine.low %v2466_v5, %v2468_v6  ;;  %s1599_s18 = sshll.u32 (%p863_p0), %s2335_s17, 7  ;;  %s1344_s30 = sshll.u32 (%p863_p0), %s2562_s19, 4  ;;  %s1345_s30 = int_to_ptr.vmem [resolvable:$true] %s1344_s30 }
 0x196   : >> { %1678 = vmatprep.subr.bf16.mxu0 %v2255_v62  ;;  %1697 = vmatpush3.bf16.msra.mxu1 %v2587_v0  ;;  %v2635_v41 = vcombine.low %v2462_v3, %v2464_v4  ;;  %v2641_v42 = vcombine.low %v2458_v1, %v2460_v2  ;;  %v868_v43 = vpack.c.bf16 %v2240_v60, %v2240_v60  ;;  %s1342_s25 = scalar_lea.hbm (%p863_p0), %s2876_s9, %s1599_s18  ;;  %s1326_s26 = scalar_lea.sflag (%p863_p0), [#allocation4], %s2440_s5 }
 0x197   : >> { %1712 = vmatprep.mubr.msk.bf16.mxu1 %vm2256_vm1, %v2255_v62  ;;  %1698 = vmatprep.subr.bf16.mxu1 %v2255_v62  ;;  %v2668_v44 = vcombine.low %v2511_v26, %v2513_v27  ;;  %v2674_v45 = vcombine.low %v2507_v24, %v2509_v25  ;;  %v2680_v46 = vcombine.low %v2503_v22, %v2505_v23  ;;  %s2126_s11 = scalar_lea.vmem (%p863_p0), %s1345_s30, 128  ;;  %p2905_p10 = scmp.ne.s32.totalorder (%p863_p0), %s2896_s27, 0 }
 0x198   : >> { %v2685_v48 = vcombine.low %v2499_v20, %v2501_v21  ;;  %v2691_v49 = vcombine.low %v2495_v18, %v2497_v19  ;;  %p2127_p5 = scmp.ne.s32.totalorder (%p863_p0), %s1345_s30, %s2126_s11  ;;  %s2257_s22 = smov (%p863_p0), [#allocation10]  }
 0x199   : >> { %1679 = vmatpush3.bf16.msra.mxu0 %v2582_v63  ;;  %s2130_s23 = sshll.u32 (%p863_p0), %s2257_s22, 4  ;;  %s2131_s23 = int_to_ptr.vmem [resolvable:$false] %s2130_s23 }
 0x19a   : >> { %1680 = vmatprep.subr.bf16.mxu0 %v2255_v62  ;;  %1699 = vmatpush3.bf16.msra.mxu1 %v2595_v35  ;;  %p2128_p1 = pnand (%p863_p0), %p2127_p5, %p2905_p10  ;;  %s2132_s7 = scalar_lea.vmem (%p863_p0), %s2131_s23, 256 }
 0x19b   : >> { %1700 = vmatprep.subr.bf16.mxu1 %v2255_v62  ;;  %p2133_p3 = scmp.lt.s32.totalorder (%p863_p0), %s1345_s30, %s2131_s23  ;;  %p2134_p9 = scmp.lt.s32.totalorder (%p863_p0), %s2132_s7, %s2126_s11 }
 0x19c   : > { %p2129_p2 = pneg (%p863_p0), %p2128_p1 }
 0x19d   : >> { %1681 = vmatpush3.bf16.msra.mxu0 %v2603_v36  ;;  %p2135_p13 = por (%p863_p0), %p2134_p9, %p2133_p3 }
 0x19e   : >> { %1682 = vmatprep.subr.bf16.mxu0 %v2255_v62  ;;  %1701 = vmatpush3.bf16.msra.mxu1 %v2609_v37 }
 0x19f   : >> { %1702 = vmatprep.subr.bf16.mxu1 %v2255_v62  ;;  %p2136_p7 = pnand (%p863_p0), %p2135_p13, %p2129_p2 }
 0x1a1   : >> { %1683 = vmatpush3.bf16.msra.mxu0 %v2615_v38 }
 0x1a2   : >> { %1684 = vmatprep.subr.bf16.mxu0 %v2255_v62  ;;  %1703 = vmatpush3.bf16.msra.mxu1 %v2668_v44 }
 0x1a3   : >> { %1704 = vmatprep.subr.bf16.mxu1 %v2255_v62 }
 0x1a5   : >> { %1685 = vmatpush3.bf16.msra.mxu0 %v2623_v39 }
 0x1a6   : >> { %1686 = vmatprep.subr.bf16.mxu0 %v2255_v62  ;;  %1705 = vmatpush3.bf16.msra.mxu1 %v2674_v45 }
 0x1a7   : >> { %1706 = vmatprep.subr.bf16.mxu1 %v2255_v62 }
 0x1a9   : >> { %1687 = vmatpush3.bf16.msra.mxu0 %v2629_v40 }
 0x1aa   : >> { %1688 = vmatprep.subr.bf16.mxu0 %v2255_v62  ;;  %1707 = vmatpush3.bf16.msra.mxu1 %v2680_v46 }
 0x1ab   : >> { %1708 = vmatprep.subr.bf16.mxu1 %v2255_v62 }
 0x1ad   : >> { %1689 = vmatpush3.bf16.msra.mxu0 %v2635_v41 }
 0x1ae   : >> { %1690 = vmatprep.subr.bf16.mxu0 %v2255_v62  ;;  %1709 = vmatpush3.bf16.msra.mxu1 %v2685_v48 }
 0x1af   : >> { %1710 = vmatprep.subr.bf16.mxu1 %v2255_v62 }
 0x1b1   : >> { %1691 = vmatpush3.bf16.msra.mxu0 %v2641_v42 }
 0x1b2   : >> { %1716 = vmatprep.subr.bf16.mxu0 %v2255_v62  ;;  %1711 = vmatpush3.bf16.msra.mxu1 %v2691_v49 }
 0x1b3   : >> { %1736 = vmatprep.subr.bf16.mxu1 %v2255_v62 }
 0x1b4   : >> { %1693 = vmatmul.mubr.bf16.vlgmr.msra.gmra.mxu0 %v868_v43 }
 0x1b5   : >> { %1717 = vmatpush3.bf16.msra.mxu0 %v2576_v61  ;;  %1732 = vmatprep.mubr.msk.bf16.mxu0 %vm2256_vm1, %v2255_v62 }
 0x1b6   : >> { %1718 = vmatprep.subr.bf16.mxu0 %v2255_v62 }
 0x1b9   : >> { %1719 = vmatpush3.bf16.msra.mxu0 %v2582_v63 }
 0x1ba   : >> { %1720 = vmatprep.subr.bf16.mxu0 %v2255_v62 }
 0x1bd   : >> { %1721 = vmatpush3.bf16.msra.mxu0 %v2603_v36 }
 0x1be   : >> { %1722 = vmatprep.subr.bf16.mxu0 %v2255_v62 }
 0x1c1   : >> { %1723 = vmatpush3.bf16.msra.mxu0 %v2615_v38 }
 0x1c2   : >> { %1724 = vmatprep.subr.bf16.mxu0 %v2255_v62 }
 0x1c5   : >> { %1725 = vmatpush3.bf16.msra.mxu0 %v2623_v39 }
 0x1c6   : >> { %1726 = vmatprep.subr.bf16.mxu0 %v2255_v62 }
 0x1c9   : >> { %1727 = vmatpush3.bf16.msra.mxu0 %v2629_v40 }
 0x1ca   : >> { %1728 = vmatprep.subr.bf16.mxu0 %v2255_v62 }
 0x1cd   : >> { %1729 = vmatpush3.bf16.msra.mxu0 %v2635_v41 }
 0x1ce   : >> { %1730 = vmatprep.subr.bf16.mxu0 %v2255_v62 }
 0x1d1   : >> { %1731 = vmatpush3.bf16.msra.mxu0 %v2641_v42 }
 0x1d2   : >> { %1756 = vmatprep.subr.bf16.mxu0 %v2255_v62 }
 0x274   : >> { %v957_v50 = vpop.f32.mrf.mxu0 }
 0x275   : >> { %v958_v51 = vadd.f32 %v2493_v17, %v957_v50 }
 0x276   : >> { %v1694_v52 = vpop.f32.mrf.mxu0 }
 0x277   : >> { %2012 = vtanh.f32 %v958_v51 }
 0x278   : >> { %v960_v53 = vpop.f32.mrf.mxu0 }
 0x27a   : >> { %v1695_v54 = vpop.f32.mrf.mxu0 }
 0x284   : >> { %v2013_v55 = vpop.eup %2012 }
 0x285   : >> { %v964_v56 = vpack.c.bf16 %v2013_v55, %v2013_v55 }
 0x287   : >> { %1713 = vmatmul.mubr.bf16.vlgmr.msra.gmra.mxu1 %v964_v56 }
 0x288   : >> { %1737 = vmatpush3.bf16.msra.mxu1 %v2587_v0  ;;  %1752 = vmatprep.mubr.msk.bf16.mxu1 %vm2256_vm1, %v2255_v62 }
 0x289   : >> { %1738 = vmatprep.subr.bf16.mxu1 %v2255_v62 }
 0x28c   : >> { %1739 = vmatpush3.bf16.msra.mxu1 %v2595_v35 }
 0x28d   : >> { %1740 = vmatprep.subr.bf16.mxu1 %v2255_v62 }
 0x290   : >> { %1741 = vmatpush3.bf16.msra.mxu1 %v2609_v37 }
 0x291   : >> { %1742 = vmatprep.subr.bf16.mxu1 %v2255_v62 }
 0x294   : >> { %1743 = vmatpush3.bf16.msra.mxu1 %v2668_v44 }
 0x295   : >> { %1744 = vmatprep.subr.bf16.mxu1 %v2255_v62 }
 0x298   : >> { %1745 = vmatpush3.bf16.msra.mxu1 %v2674_v45 }
 0x299   : >> { %1746 = vmatprep.subr.bf16.mxu1 %v2255_v62 }
 0x29c   : >> { %1747 = vmatpush3.bf16.msra.mxu1 %v2680_v46 }
 0x29d   : >> { %1748 = vmatprep.subr.bf16.mxu1 %v2255_v62 }
 0x2a0   : >> { %1749 = vmatpush3.bf16.msra.mxu1 %v2685_v48 }
 0x2a1   : >> { %1750 = vmatprep.subr.bf16.mxu1 %v2255_v62 }
 0x2a4   : >> { %1751 = vmatpush3.bf16.msra.mxu1 %v2691_v49 }
 0x2a5   : >> { %1776 = vmatprep.subr.bf16.mxu1 %v2255_v62 }
 0x347   : >> { %v1053_v57 = vpop.f32.mrf.mxu1 }
 0x348   : >> { %v2716_v58 = vadd.f32 %v2530_v34, %v1053_v57 }
 0x349   : >> { %v1714_v59 = vpop.f32.mrf.mxu1 }
 0x34a   : >> { %v1059_v43 = vmul.f32 %v2716_v58, %v2545_v47 }
 0x34b   : >> { %v1056_v50 = vpop.f32.mrf.mxu1 }
 0x34c   : >> { %v1060_v51 = vmul.f32 0.5, %v1059_v43 }
 0x34d   : >> { %v1715_v52 = vpop.f32.mrf.mxu1 }
 0x34e   : >> { %v1061_v53 = vadd.f32 %v2240_v60, %v1060_v51 }
 0x350   : >> { %v1062_v54 = vpack.c.bf16 %v1061_v53, %v1061_v53 }
 0x352   : >> { %1733 = vmatmul.mubr.bf16.vlgmr.msra.gmra.mxu0 %v1062_v54 }
 0x353   : >> { %1757 = vmatpush3.bf16.msra.mxu0 %v2576_v61  ;;  %1772 = vmatprep.mubr.msk.bf16.mxu0 %vm2256_vm1, %v2255_v62 }
 0x354   : >> { %1758 = vmatprep.subr.bf16.mxu0 %v2255_v62 }
 0x357   : >> { %1759 = vmatpush3.bf16.msra.mxu0 %v2582_v63 }
 0x358   : >> { %1760 = vmatprep.subr.bf16.mxu0 %v2255_v62 }
 0x35b   : >> { %1761 = vmatpush3.bf16.msra.mxu0 %v2603_v36 }
 0x35c   : >> { %1762 = vmatprep.subr.bf16.mxu0 %v2255_v62 }
 0x35f   : >> { %1763 = vmatpush3.bf16.msra.mxu0 %v2615_v38 }
 0x360   : >> { %1764 = vmatprep.subr.bf16.mxu0 %v2255_v62 }
 0x363   : >> { %1765 = vmatpush3.bf16.msra.mxu0 %v2623_v39 }
 0x364   : >> { %1766 = vmatprep.subr.bf16.mxu0 %v2255_v62 }
 0x367   : >> { %1767 = vmatpush3.bf16.msra.mxu0 %v2629_v40 }
 0x368   : >> { %1768 = vmatprep.subr.bf16.mxu0 %v2255_v62 }
 0x36b   : >> { %1769 = vmatpush3.bf16.msra.mxu0 %v2635_v41 }
 0x36c   : >> { %1770 = vmatprep.subr.bf16.mxu0 %v2255_v62 }
 0x36f   : >> { %1771 = vmatpush3.bf16.msra.mxu0 %v2641_v42 }
 0x370   : >> { %1796 = vmatprep.subr.bf16.mxu0 %v2255_v62 }
 0x412   : >> { %v1097_v55 = vpop.f32.mrf.mxu0 }
 0x413   : >> { %v1098_v56 = vadd.f32 %v2493_v17, %v1097_v55 }
 0x414   : >> { %v1734_v57 = vpop.f32.mrf.mxu0 }
 0x415   : >> { %2014 = vtanh.f32 %v1098_v56 }
 0x416   : >> { %v1100_v59 = vpop.f32.mrf.mxu0 }
 0x418   : >> { %v1735_v43 = vpop.f32.mrf.mxu0 }
 0x422   : >> { %v2015_v50 = vpop.eup %2014 }
 0x423   : >> { %v1104_v51 = vpack.c.bf16 %v2015_v50, %v2015_v50 }
 0x425   : >> { %1753 = vmatmul.mubr.bf16.vlgmr.msra.gmra.mxu1 %v1104_v51 }
 0x426   : >> { %1777 = vmatpush3.bf16.msra.mxu1 %v2587_v0  ;;  %1792 = vmatprep.mubr.msk.bf16.mxu1 %vm2256_vm1, %v2255_v62 }
 0x427   : >> { %1778 = vmatprep.subr.bf16.mxu1 %v2255_v62 }
 0x42a   : >> { %1779 = vmatpush3.bf16.msra.mxu1 %v2595_v35 }
 0x42b   : >> { %1780 = vmatprep.subr.bf16.mxu1 %v2255_v62 }
 0x42e   : >> { %1781 = vmatpush3.bf16.msra.mxu1 %v2609_v37 }
 0x42f   : >> { %1782 = vmatprep.subr.bf16.mxu1 %v2255_v62 }
 0x432   : >> { %1783 = vmatpush3.bf16.msra.mxu1 %v2668_v44 }
 0x433   : >> { %1784 = vmatprep.subr.bf16.mxu1 %v2255_v62 }
 0x436   : >> { %1785 = vmatpush3.bf16.msra.mxu1 %v2674_v45 }
 0x437   : >> { %1786 = vmatprep.subr.bf16.mxu1 %v2255_v62 }
 0x43a   : >> { %1787 = vmatpush3.bf16.msra.mxu1 %v2680_v46 }
 0x43b   : >> { %1788 = vmatprep.subr.bf16.mxu1 %v2255_v62 }
 0x43e   : >> { %1789 = vmatpush3.bf16.msra.mxu1 %v2685_v48 }
 0x43f   : >> { %1790 = vmatprep.subr.bf16.mxu1 %v2255_v62 }
 0x442   : >> { %1791 = vmatpush3.bf16.msra.mxu1 %v2691_v49 }
 0x443   : >> { %1816 = vmatprep.subr.bf16.mxu1 %v2255_v62 }
 0x4e5   : >> { %v1139_v52 = vpop.f32.mrf.mxu1 }
 0x4e6   : >> { %v1140_v53 = vadd.f32 %v2530_v34, %v1139_v52 }
 0x4e7   : >> { %v1754_v54 = vpop.f32.mrf.mxu1 }
 0x4e8   : >> { %v1145_v55 = vmul.f32 %v1140_v53, %v2545_v47 }
 0x4e9   : >> { %v1142_v56 = vpop.f32.mrf.mxu1 }
 0x4ea   : >> { %v1146_v57 = vmul.f32 0.5, %v1145_v55 }
 0x4eb   : >> { %v1755_v59 = vpop.f32.mrf.mxu1 }
 0x4ec   : >> { %v1147_v43 = vadd.f32 %v2240_v60, %v1146_v57 }
 0x4ee   : >> { %v1148_v50 = vpack.c.bf16 %v1147_v43, %v1147_v43 }
 0x4f0   : >> { %1773 = vmatmul.mubr.bf16.vlgmr.msra.gmra.mxu0 %v1148_v50 }
 0x4f1   : >> { %1797 = vmatpush3.bf16.msra.mxu0 %v2576_v61  ;;  %1812 = vmatprep.mubr.msk.bf16.mxu0 %vm2256_vm1, %v2255_v62 }
 0x4f2   : >> { %1798 = vmatprep.subr.bf16.mxu0 %v2255_v62 }
 0x4f5   : >> { %1799 = vmatpush3.bf16.msra.mxu0 %v2582_v63 }
 0x4f6   : >> { %1800 = vmatprep.subr.bf16.mxu0 %v2255_v62 }
 0x4f9   : >> { %1801 = vmatpush3.bf16.msra.mxu0 %v2603_v36 }
 0x4fa   : >> { %1802 = vmatprep.subr.bf16.mxu0 %v2255_v62 }
 0x4fd   : >> { %1803 = vmatpush3.bf16.msra.mxu0 %v2615_v38 }
 0x4fe   : >> { %1804 = vmatprep.subr.bf16.mxu0 %v2255_v62 }
 0x501   : >> { %1805 = vmatpush3.bf16.msra.mxu0 %v2623_v39 }
 0x502   : >> { %1806 = vmatprep.subr.bf16.mxu0 %v2255_v62 }
 0x505   : >> { %1807 = vmatpush3.bf16.msra.mxu0 %v2629_v40 }
 0x506   : >> { %1808 = vmatprep.subr.bf16.mxu0 %v2255_v62 }
 0x509   : >> { %1809 = vmatpush3.bf16.msra.mxu0 %v2635_v41 }
 0x50a   : >> { %1810 = vmatprep.subr.bf16.mxu0 %v2255_v62 }
 0x50d   : >> { %1811 = vmatpush3.bf16.msra.mxu0 %v2641_v42 }
 0x5b0   : >> { %v1183_v61 = vpop.f32.mrf.mxu0 }
 0x5b1   : >> { %v1184_v63 = vadd.f32 %v2493_v17, %v1183_v61 }
 0x5b2   : >> { %v1774_v36 = vpop.f32.mrf.mxu0 }
 0x5b3   : >> { %2016 = vtanh.f32 %v1184_v63 }
 0x5b4   : >> { %v1186_v38 = vpop.f32.mrf.mxu0 }
 0x5b6   : >> { %v1775_v51 = vpop.f32.mrf.mxu0 }
 0x5c0   : >> { %v2017_v39 = vpop.eup %2016 }
 0x5c1   : >> { %v1190_v52 = vpack.c.bf16 %v2017_v39, %v2017_v39 }
 0x5c3   : >> { %1793 = vmatmul.mubr.bf16.vlgmr.msra.gmra.mxu1 %v1190_v52 }
 0x5c4   : >> { %1817 = vmatpush3.bf16.msra.mxu1 %v2587_v0  ;;  %1832 = vmatprep.mubr.msk.bf16.mxu1 %vm2256_vm1, %v2255_v62  ;;  %v1316_v0 = vmul.f32 2.0, %v1140_v53 }
 0x5c5   : >> { %1818 = vmatprep.subr.bf16.mxu1 %v2255_v62 }
 0x5c6   : >> { %v1317_v41 = vadd.f32 %v1316_v0, %v2716_v58 }
 0x5c8   : >> { %1819 = vmatpush3.bf16.msra.mxu1 %v2595_v35 }
 0x5c9   : >> { %1820 = vmatprep.subr.bf16.mxu1 %v2255_v62 }
 0x5cc   : >> { %1821 = vmatpush3.bf16.msra.mxu1 %v2609_v37 }
 0x5cd   : >> { %1822 = vmatprep.subr.bf16.mxu1 %v2255_v62 }
 0x5d0   : >> { %1823 = vmatpush3.bf16.msra.mxu1 %v2668_v44 }
 0x5d1   : >> { %1824 = vmatprep.subr.bf16.mxu1 %v2255_v62 }
 0x5d4   : >> { %1825 = vmatpush3.bf16.msra.mxu1 %v2674_v45 }
 0x5d5   : >> { %1826 = vmatprep.subr.bf16.mxu1 %v2255_v62 }
 0x5d8   : >> { %1827 = vmatpush3.bf16.msra.mxu1 %v2680_v46 }
 0x5d9   : >> { %1828 = vmatprep.subr.bf16.mxu1 %v2255_v62 }
 0x5dc   : >> { %1829 = vmatpush3.bf16.msra.mxu1 %v2685_v48 }
 0x5dd   : >> { %1830 = vmatprep.subr.bf16.mxu1 %v2255_v62 }
 0x5e0   : >> { %1831 = vmatpush3.bf16.msra.mxu1 %v2691_v49 }
 0x683   : >> { %v1225_v35 = vpop.f32.mrf.mxu1 }
 0x684   : >> { %v1226_v37 = vadd.f32 %v2530_v34, %v1225_v35 }
 0x685   : >> { %v1794_v40 = vpop.f32.mrf.mxu1 }
 0x686   : >> { %v1231_v42 = vmul.f32 %v1226_v37, %v2545_v47  ;;  %v1318_v44 = vmul.f32 2.0, %v1226_v37 }
 0x687   : >> { %v1228_v45 = vpop.f32.mrf.mxu1 }
 0x688   : >> { %v1232_v46 = vadd.f32 %v2240_v60, %v1231_v42  ;;  %v1319_v54 = vadd.f32 %v1318_v44, %v1317_v41 }
 0x689   : >> { %v1795_v55 = vpop.f32.mrf.mxu1 }
 0x68a   : >> { %v1233_v48 = vpack.c.bf16 %v1232_v46, %v1232_v46 }
 0x68c   : >> { %1813 = vmatmul.mubr.bf16.vlgmr.msra.gmra.mxu0 %v1233_v48 }
 0x74c   : >> { %v1268_v62 = vpop.f32.mrf.mxu0 }
 0x74d   : >> { %v1269_v49 = vadd.f32 %v2493_v17, %v1268_v62 }
 0x74e   : >> { %v1814_v53 = vpop.f32.mrf.mxu0 }
 0x74f   : >> { %2018 = vtanh.f32 %v1269_v49 }
 0x750   : >> { %v1271_v56 = vpop.f32.mrf.mxu0 }
 0x752   : >> { %v1815_v57 = vpop.f32.mrf.mxu0 }
 0x75c   : >> { %v2019_v59 = vpop.eup %2018 }
 0x75d   : >> { %v1275_v43 = vpack.c.bf16 %v2019_v59, %v2019_v59 }
 0x75f   : >> { %1833 = vmatmul.mubr.bf16.vlgmr.msra.gmra.mxu1 %v1275_v43 }
 0x81f   : >> { %v1310_v58 = vpop.f32.mrf.mxu1 }
 0x820   : >> { %v1311_v50 = vadd.f32 %v2530_v34, %v1310_v58 }
 0x821   : >> { %v1834_v61 = vpop.f32.mrf.mxu1 }
 0x822   : >> { %v1320_v63 = vadd.f32 %v1319_v54, %v1311_v50 }
 0x823   : >> { %v1313_v36 = vpop.f32.mrf.mxu1 }
 0x824   : >> { %v1321_v38 = vmul.f32 0.16666667, %v1320_v63 }
 0x825   : >> { %v1835_v51 = vpop.f32.mrf.mxu1 }
 0x826   : >> { %v1322_v39 = vmul.f32 %v1321_v38, %v2545_v47  ;;  %865 = sbr.rel (!%p863_p0) target bundleno = 403 (0x193), region = 143 }
 0x828   : >> { %v1323_v52 = vadd.f32 %v2240_v60, %v1322_v39  }
 0x82a   : >> { %v2904_v60 = vmov %v1323_v52  ;;  %1324 = vst [vmem:[%s2562_s19] sm:$0xff] (%p863_p0), %v1323_v52 }
 0x82b   : > { %2139 = shalt.err (!%p2136_p7)
}
 0x82c   : > { %s2140_s3 = scalar_lea.hbm %s1342_s25, 128  ;;  %s2144_s21 = scalar_lea.hbm %s2876_s9, 256 }
 0x82d   : > { %p2141_p4 = scmp.ne.s32.totalorder %s1342_s25, %s2140_s3  ;;  %p2145_p11 = scmp.lt.s32.totalorder %s1342_s25, %s2876_s9 }
 0x82e   : > { %p2146_p12 = scmp.lt.s32.totalorder %s2144_s21, %s2140_s3 }
 0x82f   : > { %p2142_p8 = pnand %p2141_p4, %p2905_p10 }
 0x830   : > { %p2147_p0 = por %p2146_p12, %p2145_p11 }
 0x831   : > { %p2143_p6 = pneg %p2142_p8 }
 0x833   : > { %p2148_p5 = pnand %p2147_p0, %p2143_p6 }
 0x835   : > { %2151 = shalt.err (!%p2148_p5)
}
 0x836   : > { %1850 = dma.vmem_to_hbm [thread:$0]  (%p2905_p10), %s1345_s30, 128, %s1342_s25, %s1326_s26  }
 0x837   : > { %s1355_s23 = scalar_lea.hbm %s2877_s10, %s1599_s18  ;;  %s1357_s7 = sshll.u32 %s2557_s15, 4  ;;  %s1358_s7 = int_to_ptr.vmem [resolvable:$true] %s1357_s7 }
 0x838   : > { %s1331_s24 = scalar_lea.sflag [#allocation12], %s2440_s5  ;;  %s2152_s19 = scalar_lea.vmem %s1358_s7, 128 }
 0x839   : > { %p2153_p1 = scmp.ne.s32.totalorder %s1358_s7, %s2152_s19  ;;  %s2258_s3 = smov [#allocation11]  }
 0x83a   : > { %s2156_s21 = sshll.u32 %s2258_s3, 4  ;;  %s2157_s21 = int_to_ptr.vmem [resolvable:$false] %s2156_s21 }
 0x83b   : > { %p2154_p2 = pnand %p2153_p1, %p2905_p10  ;;  %s2158_s28 = scalar_lea.vmem %s2157_s21, 256 }
 0x83c   : > { %p2159_p9 = scmp.lt.s32.totalorder %s1358_s7, %s2157_s21  ;;  %p2160_p13 = scmp.lt.s32.totalorder %s2158_s28, %s2152_s19 }
 0x83d   : > { %p2155_p3 = pneg %p2154_p2 }
 0x83e   : > { %p2161_p7 = por %p2160_p13, %p2159_p9 }
 0x840   : > { %p2162_p4 = pnand %p2161_p7, %p2155_p3 }
 0x842   : > { %2165 = shalt.err (!%p2162_p4)
}
 0x843   : > { %s2166_s17 = scalar_lea.hbm %s1355_s23, 128  ;;  %s2170_s18 = scalar_lea.hbm %s2877_s10, 256 }
 0x844   : > { %p2167_p8 = scmp.ne.s32.totalorder %s1355_s23, %s2166_s17  ;;  %p2171_p12 = scmp.lt.s32.totalorder %s1355_s23, %s2877_s10 }
 0x845   : > { %p2172_p0 = scmp.lt.s32.totalorder %s2170_s18, %s2166_s17 }
 0x846   : > { %p2168_p6 = pnand %p2167_p8, %p2905_p10 }
 0x847   : > { %p2173_p5 = por %p2172_p0, %p2171_p12 }
 0x848   : > { %p2169_p11 = pneg %p2168_p6 }
 0x84a   : > { %p2174_p1 = pnand %p2173_p5, %p2169_p11 }
 0x84c   : > { %2177 = shalt.err (!%p2174_p1)
}
 0x84d   : > { %1851 = dma.vmem_to_hbm [thread:$0]  (%p2905_p10), %s1358_s7, 128, %s1355_s23, %s1331_s24  }
 0x84e PF: > { %s1369_s26 = sand.u32 1, %s2224_s13   ;;  %p2906_p2 = scmp.ne.s32.totalorder %s2888_s20, 0 }
 0x84f   : > { %p2907_p3 = scmp.ge.s32.totalorder %s2236_s16, 2  ;;  %s1370_s12 = scalar_lea.sflag [#allocation4], %s1369_s26 }
 0x851   : > { %p1869_p9 = pnand %p2907_p3, %p2906_p2 }
 0x853   : > { %p1870_p13 = pneg %p1869_p9 }
 0x855   : > { %2215 = dma.done.wait (%p1870_p13), %s1370_s12, 128  }
 0x856   : > { %2217 = vsyncadd (%p1870_p13), %s1370_s12, 4294967168  ;;  %s1379_s11 = scalar_lea.sflag [#allocation12], %s1369_s26 }
 0x857   : > { %2219 = dma.done.wait (%p1870_p13), %s1379_s11, 128  }
 0x858   : > { %2221 = vsyncadd (%p1870_p13), %s1379_s11, 4294967168  ;;  %s2908_s22 = sld [smem:[#allocation18_spill]]  ;;  %p29_p10 = scmp.ge.s32.totalorder %s2386_s29, 4  }
 0x859   : > { %s2909_s15 = sld [smem:[#allocation19_spill]]  ;;  %s2910_s13 = smov %s2228_s14 }
 0x85a   : > { %s2912_s16 = smov %s2386_s29  ;;  %31 = sbr.rel (!%p29_p10) target bundleno = 13 (0xd), region = 154 }
 0x85e   : > { %s2911_s14 = smov %s2908_s22 }
 0x85f   :  { %1384 = vsyncpa [#allocation3], 1 }
 0x860   :  { %1386 = vsyncpa [#allocation3 + $0x1], 1 }
 0x861   :  { %1387 = vsyncpa [#allocation6], 1 }
 0x862   :  { %1388 = vsyncpa [#allocation9], 1 }
 0x863   :  { %1389 = vsyncpa [#allocation4], 1 }
 0x864   :  { %1391 = vsyncpa [#allocation4 + $0x1], 1 }
 0x865   :  { %1392 = vsyncpa [#allocation12], 1 }
 0x866   :  { %1394 = vsyncpa [#allocation12 + $0x1], 1 }

// kernel: tpu_custom_call.1
= control target key start
LH: loop header
LB: loop body
LE: loop exit
PB: predicated region body
PF: predicated region fallthrough
CT: control target
= control target key end

     0   :  { %s2867_s0 = inlined_call_operand.hbm [shape: f32[16,144], index: 0, kind: input, shape index: {}]   ;;  %s2868_s1 = inlined_call_operand.vmem [shape: f32[16,128], index: 1, kind: input, shape index: {}]   ;;  %s2869_s2 = inlined_call_operand.vmem [shape: f32[16,1], index: 2, kind: input, shape index: {}]   ;;  %s2870_s3 = inlined_call_operand.hbm [shape: bf16[144,512], index: 3, kind: input, shape index: {}]   ;;  %s2871_s4 = inlined_call_operand.vmem [shape: f32[1,512], index: 4, kind: input, shape index: {}]   ;;  %s2872_s5 = inlined_call_operand.hbm [shape: bf16[128,128], index: 5, kind: input, shape index: {}]   ;;  %s2873_s6 = inlined_call_operand.vmem [shape: f32[1,128], index: 6, kind: input, shape index: {}]   ;;  %s2874_s7 = inlined_call_operand.hbm [shape: bf16[128,128], index: 7, kind: input, shape index: {}]   ;;  %s2875_s8 = inlined_call_operand.vmem [shape: f32[1,128], index: 8, kind: input, shape index: {}]   ;;  %s2876_s9 = inlined_call_operand.hbm [shape: f32[16,128], index: 9, kind: output, shape index: {0}]   ;;  %s2877_s10 = inlined_call_operand.hbm [shape: f32[16,128], index: 10, kind: output, shape index: {1}]  }
   0x1   :  { %2883 = sst [smem:[#allocation20_spill]] %s2870_s3 }
   0x2   :  { %2884 = sst [smem:[#allocation21_spill]] %s2872_s5 }
   0x3   :  { %2885 = sst [smem:[#allocation22_spill]] %s2874_s7 }
   0x4   :  { %16 = vsyncpa [#allocation3], 0 }
   0x5   :  { %18 = vsyncpa [#allocation3 + $0x1], 0 }
   0x6   :  { %19 = vsyncpa [#allocation6], 0 }
   0x7   :  { %20 = vsyncpa [#allocation9], 0 }
   0x8   :  { %21 = vsyncpa [#allocation4], 0 }
   0x9   :  { %23 = vsyncpa [#allocation4 + $0x1], 0 }
   0xa   :  { %24 = vsyncpa [#allocation12], 0 }
   0xb   :  { %26 = vsyncpa [#allocation12 + $0x1], 0  ;;  %s2314_s13 = smov 0   ;;  %s2316_s14 = smov 0  }
   0xc   :  { %s2318_s15 = smov 0   ;;  %s2320_s16 = smov 0  }
   0xd LB: > { %2886 = sst [smem:[#allocation18_spill]] %s2232_s15  ;;  %s2335_s17 = sadd.s32 4294967295, %s2236_s16   ;;  %s2236_s16 = sphi %s2320_s16, %s2912_s16   ;;  %s2232_s15 = sphi %s2318_s15, %s2909_s15   ;;  %s2228_s14 = sphi %s2316_s14, %s2911_s14   ;;  %s2224_s13 = sphi %s2314_s13, %s2910_s13  }
   0xe   : > { %s1520_s18 = sadd.s32 4294967294, %s2236_s16   ;;  %p52_p0 = scmp.ne.s32.totalorder %s2228_s14, %s2224_s13 }
   0xf   : > { %p2878_p1 = scmp.eq.s32.totalorder %s2335_s17, 0  ;;  %p260_p3 = scmp.eq.s32.totalorder %s1520_s18, 1 }
  0x10   : > { %p1521_p5 = scmp.ge.s32.totalorder %s2236_s16, 1  ;;  %p293_p7 = scmp.lt.s32.totalorder %s2236_s16, 3 }
  0x11   : > { %p2344_p4 = por %p2878_p1, %p52_p0  ;;  %p2349_p6 = por %p260_p3, %p52_p0 }
  0x12   : > { %p2354_p8 = pnand %p1521_p5, %p293_p7  ;;  %s2246_s22 = smov [#allocation5]  }
  0x13   : > { %s2887_s19 = scalar_select %p2344_p4, 1, 0 }
  0x14   : > { %s2888_s20 = scalar_select %p2349_p6, 1, 0 }
  0x15   : > { %s2889_s21 = scalar_select %p2354_p8, 1, 0 }
  0x16   : > { %s305_s23 = sshll.u32 %s2246_s22, 4  ;;  %p1854_p9 = pneg %p2354_p8  ;;  %s306_s23 = int_to_ptr.vmem [resolvable:$true] %s305_s23 }
  0x17   : > { %s2247_s25 = smov [#allocation7]   ;;  %s2031_s27 = scalar_lea.vmem %s306_s23, 4608 }
  0x18   : > { %p2363_p11 = pnand %p1854_p9, %p2878_p1  ;;  %s321_s26 = sshll.u32 %s2247_s25, 4  ;;  %s322_s26 = int_to_ptr.vmem [resolvable:$true] %s321_s26 }
  0x19   : > { %p2032_p13 = scmp.ne.s32.totalorder %s306_s23, %s2031_s27  ;;  %p2039_p5 = scmp.lt.s32.totalorder %s306_s23, %s306_s23 }
  0x1a   : > { %p2022_p12 = pneg %p2363_p11  ;;  %p2040_p7 = scmp.lt.s32.totalorder %s2031_s27, %s2031_s27 }
  0x1c   : > { %p2034_p0 = pnand %p2032_p13, %p2022_p12  ;;  %p2041_p10 = por %p2040_p7, %p2039_p5 }
  0x1e   : > { %p2035_p3 = pneg %p2034_p0 }
  0x20   : > { %p2042_p9 = pnand %p2041_p10, %p2035_p3 }
  0x22   : > { %2045 = shalt.err (!%p2042_p9)
}
  0x23   : > { %s2248_s28 = smov 256   ;;  %s2249_s29 = smov 16  }
  0x24   : > { %s2891_s3 = sld [smem:[#allocation20_spill]]  ;;  %s2057_s12 = scalar_lea.vmem %s322_s26, 1024 }
  0x25   : > { %p2058_p1 = scmp.ne.s32.totalorder %s322_s26, %s2057_s12  ;;  %p2065_p2 = scmp.lt.s32.totalorder %s322_s26, %s322_s26 }
  0x26   : > { %p2066_p6 = scmp.lt.s32.totalorder %s2057_s12, %s2057_s12 }
  0x27   : > { %p2060_p13 = pnand %p2058_p1, %p2022_p12 }
  0x28   : > { %p2067_p5 = por %p2066_p6, %p2065_p2 }
  0x29   : > { %p2061_p0 = pneg %p2060_p13 }
  0x2a   : > { %1857 = dma.hbm_to_vmem [thread:$0]  (!%p2363_p11), %s2891_s3, 4608, %s306_s23, [#allocation6], %s2248_s28, %s2248_s28, %s2249_s29  }
  0x2b   : > { %p2068_p10 = pnand %p2067_p5, %p2061_p0 }
  0x2d   : > { %2071 = shalt.err (!%p2068_p10)
}
  0x2e   : > { %s2250_s18 = smov 64   ;;  %s2251_s22 = smov 4  }
  0x2f   : > { %s2892_s5 = sld [smem:[#allocation21_spill]]  ;;  %s2252_s23 = smov [#allocation8]  }
  0x30   : > { %s337_s28 = sshll.u32 %s2252_s23, 4  ;;  %s2386_s29 = sadd.s32 1, %s2236_s16   ;;  %s338_s28 = int_to_ptr.vmem [resolvable:$true] %s337_s28 }
  0x31   : > { %s2083_s30 = scalar_lea.vmem %s338_s28, 1024  ;;  %p2091_p3 = scmp.lt.s32.totalorder %s338_s28, %s338_s28 }
  0x32   : > { %p2084_p1 = scmp.ne.s32.totalorder %s338_s28, %s2083_s30  ;;  %p2092_p7 = scmp.lt.s32.totalorder %s2083_s30, %s2083_s30 }
  0x34   : > { %p2086_p2 = pnand %p2084_p1, %p2022_p12  ;;  %p2093_p9 = por %p2092_p7, %p2091_p3 }
  0x35   : > { %1860 = dma.hbm_to_vmem [thread:$0]  (!%p2363_p11), %s2892_s5, 1024, %s322_s26, [#allocation6], %s2250_s18, %s2250_s18, %s2251_s22  }
  0x36   : > { %p2087_p6 = pneg %p2086_p2 }
  0x38   : > { %p2094_p13 = pnand %p2093_p9, %p2087_p6 }
  0x3a   : > { %2097 = shalt.err (!%p2094_p13)
}
  0x3b   : > { %s2893_s7 = sld [smem:[#allocation22_spill]]  ;;  %s36_s12 = ssub.s32 %s2236_s16, %s2386_s29 }
  0x3c   : > { %s39_s25 = sadd.s32 1, %s2232_s15  ;;  %p37_p12 = scmp.eq.s32.totalorder %s36_s12, 0 }
  0x3d   : > { %p46_p0 = scmp.ne.s32.totalorder %s2232_s15, %s2228_s14  ;;  %p47_p5 = scmp.eq.s32.totalorder %s2236_s16, 0 }
  0x3e   : > { %p1878_p10 = scmp.lt.s32.totalorder %s2236_s16, 2  ;;  %p2895_p2 = scmp.eq.s32.totalorder %s2335_s17, 1 }
  0x3f   : > { %s2404_s24 = scalar_select %p37_p12, %s2232_s15, %s39_s25  }
  0x40   : > { %p48_p1 = por %p47_p5, %p46_p0  ;;  %p2408_p6 = por %p2895_p2, %p46_p0 }
  0x41   : > { %1863 = dma.hbm_to_vmem [thread:$0]  (!%p2363_p11), %s2893_s7, 1024, %s338_s28, [#allocation9], %s2250_s18, %s2250_s18, %s2251_s22  }
  0x42   : > { %2894 = sst [smem:[#allocation19_spill]] %s2404_s24  ;;  %s354_s23 = sand.u32 1, %s2232_s15  }
  0x43   : > { %s2896_s27 = scalar_select %p2408_p6, 1, 0 }
  0x44   : > { %s1603_s30 = sshll.u32 %s2236_s16, 8  ;;  %s1526_s11 = sshll.u32 %s354_s23, 4 }
  0x45   : > { %s2417_s18 = scalar_lea.hbm %s2867_s0, %s1603_s30  ;;  %s358_s22 = scalar_lea.vmem [#allocation2], %s1526_s11 }
  0x46   : > { %s366_s28 = sshll.u32 %s358_s22, 4  ;;  %p2419_p11 = pnand %p1878_p10, %p48_p1  ;;  %s367_s28 = int_to_ptr.vmem [resolvable:$true] %s366_s28 }
  0x47   : > { %s355_s25 = scalar_lea.sflag [#allocation3], %s354_s23  ;;  %s2098_s5 = scalar_lea.hbm %s2417_s18, 256 }
  0x48   : > { %p2099_p3 = scmp.ne.s32.totalorder %s2417_s18, %s2098_s5  ;;  %p2100_p7 = pneg %p2419_p11 }
  0x49   : > { %s2103_s26 = scalar_lea.hbm %s2867_s0, 512  ;;  %p2104_p12 = scmp.lt.s32.totalorder %s2417_s18, %s2867_s0 }
  0x4a   : > { %p2101_p9 = pnand %p2100_p7, %p2099_p3  ;;  %p2105_p0 = scmp.lt.s32.totalorder %s2103_s26, %s2098_s5 }
  0x4c   : > { %p2102_p13 = pneg %p2101_p9  ;;  %p2106_p5 = por %p2105_p0, %p2104_p12 }
  0x4e   : > { %p2107_p10 = pnand %p2106_p5, %p2102_p13 }
  0x50   : > { %2110 = shalt.err (!%p2107_p10)
}
  0x51   : > { %s2111_s22 = scalar_lea.vmem %s367_s28, 256  ;;  %s2253_s23 = smov [#allocation2]  }
  0x52   : > { %p2112_p1 = scmp.ne.s32.totalorder %s367_s28, %s2111_s22  ;;  %s2116_s24 = sshll.u32 %s2253_s23, 4  ;;  %s2117_s24 = int_to_ptr.vmem [resolvable:$false] %s2116_s24 }
  0x53   : > { %s2118_s15 = scalar_lea.vmem %s2117_s24, 512  ;;  %p2119_p3 = scmp.lt.s32.totalorder %s367_s28, %s2117_s24 }
  0x54   : > { %p2114_p2 = pnand %p2112_p1, %p2100_p7  ;;  %p2120_p9 = scmp.lt.s32.totalorder %s2118_s15, %s2111_s22 }
  0x56   : > { %p2115_p6 = pneg %p2114_p2  ;;  %p2121_p4 = por %p2120_p9, %p2119_p3 }
  0x58   : > { %p2122_p8 = pnand %p2121_p4, %p2115_p6 }
  0x5a   : > { %2125 = shalt.err (!%p2122_p8)
}
  0x5b   : > { %1867 = dma.hbm_to_vmem [thread:$0]  (!%p2419_p11), %s2417_s18, 256, %s367_s28, %s355_s25  }
  0x5c   : > { %p2898_p13 = scmp.ne.s32.totalorder %s2889_s21, 0 }
  0x5d   : > { %s2440_s5 = sand.u32 (!%p2898_p13), 1, %s2228_s14   ;;  %p2899_p7 = scmp.ne.s32.totalorder (!%p2898_p13), %s2887_s19, 0 }
  0x5e   : > { %389 = sbr.rel (%p2898_p13) target bundleno = 2126 (0x84e), region = 56  ;;  %s1530_s7 = sshll.u32 (!%p2898_p13), %s2440_s5, 4 }
  0x5f   : > { %s392_s3 = scalar_lea.sflag (!%p2898_p13), [#allocation3], %s2440_s5  ;;  %s2444_s24 = scalar_lea.vmem (!%p2898_p13), [#allocation2], %s1530_s7 }
  0x63   : > { %2203 = dma.done.wait (%p2899_p7), %s392_s3, 256  }
  0x64   : > { %2205 = vsyncadd (%p2899_p7), %s392_s3, 4294967040  ;;  %p2900_p4 = scmp.eq.s32.totalorder %s2335_s17, 0 }
  0x66   : > { %2207 = dma.done.wait (%p2900_p4), [#allocation6], 5632   ;;  %p2901_p8 = pmov %p2900_p4 }
  0x67   : > { %p2902_p6 = pmov %p2900_p4 }
  0x68   : > { %2209 = vsyncadd (%p2901_p8), [#allocation6], 4294961664 }
  0x69   : > { %2211 = dma.done.wait (%p2902_p6), [#allocation9], 1024   ;;  %p2903_p11 = pmov %p2900_p4 }
  0x6a   : > { %v2254_v0 = vmov 0   ;;  %v2458_v1 = vld [vmem:[#allocation7] sm:$0xf]  ;;  %v2460_v2 = vld [vmem:[#allocation7 + $0x4] sm:$0xf]  ;;  %p457_p12 = scmp.lt.s32.totalorder %s2335_s17, 1 }
  0x6b   : > { %2213 = vsyncadd (%p2903_p11), [#allocation9], 4294966272  ;;  %1941 = vset.pattern.permute.xlu0 %v2254_v0  ;;  %v2462_v3 = vld [vmem:[#allocation7 + $0x8] sm:$0xf]  ;;  %v2464_v4 = vld [vmem:[#allocation7 + $0xc] sm:$0xf] }
  0x6c   : > { %v2466_v5 = vld [vmem:[#allocation7 + $0x10] sm:$0xf]  ;;  %v2468_v6 = vld [vmem:[#allocation7 + $0x14] sm:$0xf]  ;;  %v2470_v7 = vld [vmem:[#allocation7 + $0x18] sm:$0xf] }
  0x6d   : > { %v2472_v8 = vld [vmem:[#allocation7 + $0x1c] sm:$0xf]  ;;  %v2474_v9 = vld [vmem:[#allocation7 + $0x20] sm:$0xf]  ;;  %v2476_v10 = vld [vmem:[#allocation7 + $0x24] sm:$0xf] }
  0x6e   : > { %v2478_v11 = vld [vmem:[#allocation7 + $0x28] sm:$0xf]  ;;  %v2480_v12 = vld [vmem:[#allocation7 + $0x2c] sm:$0xf]  ;;  %v2482_v13 = vld [vmem:[#allocation7 + $0x30] sm:$0xf] }
  0x6f   : > { %v2484_v14 = vld [vmem:[#allocation7 + $0x34] sm:$0xf]  ;;  %v2486_v15 = vld [vmem:[#allocation7 + $0x38] sm:$0xf]  ;;  %v2488_v16 = vld [vmem:[#allocation7 + $0x3c] sm:$0xf] }
  0x70   : > { %v2493_v17 = vld [vmem:[%s2873_s6] ss:$0 sm:$0xff]  ;;  %v2497_v19 = vld [vmem:[#allocation8 + $0x4] sm:$0xf]  ;;  %v2499_v20 = vld [vmem:[#allocation8 + $0x8] sm:$0xf] }
  0x71   : > { %v2495_v18 = vld [vmem:[#allocation8] sm:$0xf]  ;;  %v2501_v21 = vld [vmem:[#allocation8 + $0xc] sm:$0xf]  ;;  %v2503_v22 = vld [vmem:[#allocation8 + $0x10] sm:$0xf] }
  0x72   : > { %v2505_v23 = vld [vmem:[#allocation8 + $0x14] sm:$0xf]  ;;  %v2507_v24 = vld [vmem:[#allocation8 + $0x18] sm:$0xf]  ;;  %v2509_v25 = vld [vmem:[#allocation8 + $0x1c] sm:$0xf] }
  0x73   : > { %v2511_v26 = vld [vmem:[#allocation8 + $0x20] sm:$0xf]  ;;  %v2513_v27 = vld [vmem:[#allocation8 + $0x24] sm:$0xf]  ;;  %v2515_v28 = vld [vmem:[#allocation8 + $0x28] sm:$0xf] }
  0x74   : > { %v2517_v29 = vld [vmem:[#allocation8 + $0x2c] sm:$0xf]  ;;  %v2519_v30 = vld [vmem:[#allocation8 + $0x30] sm:$0xf]  ;;  %v2521_v31 = vld [vmem:[#allocation8 + $0x34] sm:$0xf] }
  0x75   : > { %v2523_v32 = vld [vmem:[#allocation8 + $0x38] sm:$0xf]  ;;  %v2525_v33 = vld [vmem:[#allocation8 + $0x3c] sm:$0xf]  ;;  %v2530_v34 = vld [vmem:[%s2875_s8] ss:$0 sm:$0xff] }
  0x76   : > { %v1942_v35 = vld [vmem:[#allocation5 + $0xe4] ss:$16 sps:$4 sm:$0xff]   ;;  %v1944_v36 = vld [vmem:[#allocation5 + $0xe0] ss:$16 sps:$4 sm:$0xff]   ;;  %v1953_v40 = vld [vmem:[#allocation5 + $0xec] ss:$16 sps:$4 sm:$0xff]  }
  0x77   : > { %v1945_v37 = vld [vmem:[#allocation5 + $0xc4] ss:$16 sps:$4 sm:$0xff]   ;;  %713 = vmatprep.subr.bf16.mxu0 %v1942_v35  ;;  %v1947_v38 = vld [vmem:[#allocation5 + $0xc0] ss:$16 sps:$4 sm:$0xff]   ;;  %v1956_v41 = vld [vmem:[#allocation5 + $0xe8] ss:$16 sps:$4 sm:$0xff]   ;;  %754 = vmatprep.subr.bf16.mxu1 %v1953_v40 }
  0x78   : > { %714 = vmatpush1.bf16.msra.mxu0 %v1944_v36  ;;  %v1948_v39 = vld [vmem:[#allocation5 + $0xa4] ss:$16 sps:$4 sm:$0xff]   ;;  %v1950_v42 = vld [vmem:[#allocation5 + $0xa0] ss:$16 sps:$4 sm:$0xff]   ;;  %v1959_v43 = vld [vmem:[#allocation5 + $0xcc] ss:$16 sps:$4 sm:$0xff]   ;;  %755 = vmatpush1.bf16.msra.mxu1 %v1956_v41 }
  0x79   : > { %715 = vmatprep.subr.bf16.mxu0 %v1945_v37  ;;  %v1951_v44 = vld [vmem:[#allocation5 + $0x84] ss:$16 sps:$4 sm:$0xff]   ;;  %v1962_v45 = vld [vmem:[#allocation5 + $0xc8] ss:$16 sps:$4 sm:$0xff]   ;;  %756 = vmatprep.subr.bf16.mxu1 %v1959_v43  ;;  %v1955_v46 = vld [vmem:[#allocation5 + $0x80] ss:$16 sps:$4 sm:$0xff]  }
  0x7a   : > { %v1965_v47 = vld [vmem:[#allocation5 + $0xac] ss:$16 sps:$4 sm:$0xff]   ;;  %v1957_v48 = vld [vmem:[#allocation5 + $0x64] ss:$16 sps:$4 sm:$0xff]   ;;  %v1968_v49 = vld [vmem:[#allocation5 + $0xa8] ss:$16 sps:$4 sm:$0xff]  }
  0x7b   : > { %v1971_v50 = vld [vmem:[#allocation5 + $0x8c] ss:$16 sps:$4 sm:$0xff]   ;;  %s2534_s28 = scalar_select %p457_p12, %s2335_s17, 1  ;;  %v1961_v51 = vld [vmem:[#allocation5 + $0x60] ss:$16 sps:$4 sm:$0xff]   ;;  %vm709_vm0 = vcmask 130048  }
  0x7c   : > { %716 = vmatpush1.bf16.msra.mxu0 %v1947_v38  ;;  %757 = vmatpush1.bf16.msra.mxu1 %v1962_v45  ;;  %v1963_v52 = vld [vmem:[#allocation5 + $0x44] ss:$16 sps:$4 sm:$0xff]   ;;  %v1974_v53 = vld [vmem:[#allocation5 + $0x88] ss:$16 sps:$4 sm:$0xff]   ;;  %v1977_v54 = vld [vmem:[#allocation5 + $0x6c] ss:$16 sps:$4 sm:$0xff]  }
  0x7d   : > { %717 = vmatprep.subr.bf16.mxu0 %v1948_v39  ;;  %758 = vmatprep.subr.bf16.mxu1 %v1965_v47  ;;  %s1536_s12 = sshll.u32 %s2534_s28, 3  ;;  %v1967_v55 = vld [vmem:[#allocation5 + $0x40] ss:$16 sps:$4 sm:$0xff]   ;;  %v1969_v56 = vld [vmem:[#allocation5 + $0x24] ss:$16 sps:$4 sm:$0xff]   ;;  %v467_v57 = vld [vmem:[%s2444_s24 + $0x8] sm:$0xff] }
  0x7e   : > { %v1980_v58 = vld [vmem:[#allocation5 + $0x68] ss:$16 sps:$4 sm:$0xff]   ;;  %v470_v59 = vpack.c.bf16 %v467_v57, %v467_v57  ;;  %v1983_v60 = vld [vmem:[#allocation5 + $0x4c] ss:$16 sps:$4 sm:$0xff]   ;;  %s464_s26 = scalar_lea.vmem %s2869_s2, %s1536_s12  ;;  %v1973_v61 = vld [vmem:[#allocation5 + $0x20] ss:$16 sps:$4 sm:$0xff]  }
  0x7f   : > { %v1975_v62 = vld [vmem:[#allocation5 + $0x4] ss:$16 sps:$4 sm:$0xff]   ;;  %v1986_v63 = vld [vmem:[#allocation5 + $0x48] ss:$16 sps:$4 sm:$0xff]   ;;  %v1987_v35 = vld [vmem:[#allocation5 + $0x2c] ss:$16 sps:$4 sm:$0xff]  }
  0x80   : > { %718 = vmatpush1.bf16.msra.mxu0 %v1950_v42  ;;  %759 = vmatpush1.bf16.msra.mxu1 %v1968_v49  ;;  %v854_v0 = vld [vmem:[%s464_s26] sm:$0xff]  ;;  %v1989_v38 = vld [vmem:[#allocation5 + $0x28] ss:$16 sps:$4 sm:$0xff]   ;;  %v1990_v39 = vld [vmem:[#allocation5 + $0xc] ss:$16 sps:$4 sm:$0xff]   ;;  %s1534_s11 = sshll.u32 %s2440_s5, 3 }
  0x81   : > { %719 = vmatprep.subr.bf16.mxu0 %v1951_v44  ;;  %760 = vmatprep.subr.bf16.mxu1 %v1971_v50  ;;  %v1979_v36 = vld [vmem:[#allocation5] ss:$16 sps:$4 sm:$0xff]   ;;  %v1981_v37 = vld [vmem:[#allocation5 + $0x104] ss:$16 sps:$4 sm:$0xff]   ;;  %v1992_v42 = vld [vmem:[#allocation5 + $0x8] ss:$16 sps:$4 sm:$0xff]  }
  0x82   : > { %1574 = vmatprep.mubr.msk.bf16.mxu0 %vm709_vm0, %v470_v59  ;;  %1575 = vmatprep.mubr.msk.bf16.mxu1 %vm709_vm0, %v470_v59  ;;  %v1985_v40 = vld [vmem:[#allocation5 + $0x100] ss:$16 sps:$4 sm:$0xff]   ;;  %v1993_v43 = vld [vmem:[#allocation5 + $0x10c] ss:$16 sps:$4 sm:$0xff]   ;;  %v1995_v45 = vld [vmem:[#allocation5 + $0x108] ss:$16 sps:$4 sm:$0xff]  }
  0x83   : > { %857 = vperm.xlu0 %1941, %v854_v0   ;;  %v466_v41 = vld [vmem:[%s2444_s24] sm:$0xff]  ;;  %s460_s24 = scalar_lea.vmem %s2868_s1, %s1536_s12  ;;  %s2557_s15 = scalar_lea.vmem [#allocation11], %s1534_s11 }
  0x84   : > { %720 = vmatpush1.bf16.msra.mxu0 %v1955_v46  ;;  %761 = vmatpush1.bf16.msra.mxu1 %v1974_v53  ;;  %v469_v44 = vpack.c.bf16 %v466_v41, %v466_v41  ;;  %s2562_s19 = scalar_lea.vmem [#allocation10], %s1534_s11  ;;  %s2566_s21 = smov 0  }
  0x85   : > { %721 = vmatprep.subr.bf16.mxu0 %v1957_v48  ;;  %762 = vmatprep.subr.bf16.mxu1 %v1977_v54  ;;  %v509_v48 = vlaneseq }
  0x87   : > { %v510_v49 = vshrl.u32 %v509_v48, 7 }
  0x88   : > { %722 = vmatpush1.bf16.msra.mxu0 %v1961_v51  ;;  %763 = vmatpush1.bf16.msra.mxu1 %v1980_v58  ;;  %v507_v51 = vld [vmem:[%s2871_s4] sm:$0xf] }
  0x89   : > { %723 = vmatprep.subr.bf16.mxu0 %v1963_v52  ;;  %764 = vmatprep.subr.bf16.mxu1 %v1983_v60  ;;  %v511_v50 = vsub.s32 0, %v510_v49  ;;  %v515_v52 = vsub.s32 1, %v510_v49 }
  0x8b   : > { %v512_v53 = vrot.slane %v507_v51, %v511_v50  ;;  %v516_v54 = vrot.slane %v507_v51, %v515_v52  ;;  %v468_v52 = vld [vmem:[%s460_s24] sm:$0xff] }
  0x8c   : > { %724 = vmatpush1.bf16.msra.mxu0 %v1967_v55  ;;  %765 = vmatpush1.bf16.msra.mxu1 %v1986_v63 }
  0x8d   : > { %725 = vmatprep.subr.bf16.mxu0 %v1969_v56  ;;  %766 = vmatprep.subr.bf16.mxu1 %v1987_v35  ;;  %v519_v35 = vsub.s32 2, %v510_v49 }
  0x90   : > { %726 = vmatpush1.bf16.msra.mxu0 %v1973_v61  ;;  %767 = vmatpush1.bf16.msra.mxu1 %v1989_v38  ;;  %v523_v61 = vsub.s32 3, %v510_v49 }
  0x91   : > { %727 = vmatprep.subr.bf16.mxu0 %v1975_v62  ;;  %768 = vmatprep.subr.bf16.mxu1 %v1990_v39  ;;  %v520_v39 = vrot.slane %v507_v51, %v519_v35 }
  0x94   : > { %728 = vmatpush1.bf16.msra.mxu0 %v1979_v36  ;;  %769 = vmatpush1.bf16.msra.mxu1 %v1992_v42 }
  0x95   : > { %743 = vmatprep.subr.bf16.mxu0 %v1981_v37  ;;  %784 = vmatprep.subr.bf16.mxu1 %v1993_v43  ;;  %v524_v37 = vrot.slane %v507_v51, %v523_v61 }
  0x98   : > { %744 = vmatpush2.bf16.msra.mxu0 %v1985_v40  ;;  %785 = vmatpush2.bf16.msra.mxu1 %v1995_v45 }
  0x9b   : > { %746 = vmatmul.mubr.bf16.vlgmr.msra.gmra.mxu0 %v469_v44  ;;  %787 = vmatmul.mubr.bf16.vlgmr.msra.gmra.mxu1 %v469_v44 }
  0xfe   : > { %v858_v46 = vpop.permute.xlu0 %857 }
  0xff   : > { %v2545_v47 = vmul.f32 0.33333334, %v858_v46 }
 0x15b   : > { %v747_v55 = vpop.f32.mrf.mxu0  ;;  %v788_v63 = vpop.f32.mrf.mxu1 }
 0x15c   : > { %v748_v56 = vadd.f32 %v747_v55, %v512_v53  ;;  %v789_v42 = vadd.f32 %v788_v63, %v520_v39 }
 0x15d   : > { %v749_v57 = vpop.f32.mrf.mxu0  ;;  %v790_v36 = vpop.f32.mrf.mxu1 }
 0x15e   : > { %v1576_v58 = vmul.f32 -1.442695, %v748_v56  ;;  %v750_v59 = vadd.f32 %v749_v57, %v516_v54  ;;  %v791_v41 = vadd.f32 %v790_v36, %v524_v37 }
 0x15f   : > { %v751_v60 = vpop.f32.mrf.mxu0  ;;  %v792_v38 = vpop.f32.mrf.mxu1 }
 0x160   : > { %1996 = vpow2.f32 %v1576_v58  ;;  %v1577_v62 = vmul.f32 -1.442695, %v750_v59  ;;  %v1578_v43 = vmul.f32 -1.442695, %v791_v41 }
 0x161   : > { %v752_v0 = vpop.f32.mrf.mxu0  ;;  %v793_v40 = vpop.f32.mrf.mxu1 }
 0x162   : > { %1998 = vpow2.f32 %v1577_v62 }
 0x163   : > { %2000 = vtanh.f32 %v789_v42 }
 0x164   : > { %2002 = vpow2.f32 %v1578_v43 }
 0x16d   : > { %v1997_v44 = vpop.eup %1996 }
 0x16e   : > { %v798_v45 = vadd.f32 1.0, %v1997_v44 }
 0x16f   : > { %v1999_v46 = vpop.eup %1998 }
 0x170   : > { %2004 = vrcp.f32 %v798_v45  ;;  %v804_v48 = vadd.f32 1.0, %v1999_v46  ;;  %v2001_v49 = vpop.eup %2000 }
 0x171   : > { %v2003_v50 = vpop.eup %2002 }
 0x172   : > { %2006 = vrcp.f32 %v804_v48  ;;  %v811_v54 = vadd.f32 1.0, %v2003_v50 }
 0x174   : > { %2008 = vrcp.f32 %v811_v54 }
 0x17d   : > { %v2005_v51 = vpop.eup %2004 }
 0x17e   : > { %v815_v56 = vmul.f32 %v2005_v51, %v2001_v49 }
 0x17f   : > { %v2007_v53 = vpop.eup %2006 }
 0x180   : > { %v814_v55 = vmul.f32 %v2007_v53, %v468_v52 }
 0x181   : > { %v2009_v58 = vpop.eup %2008 }
 0x182   : > { %v816_v57 = vadd.f32 %v815_v56, %v814_v55 }
 0x184   : > { %817 = vst [vmem:[%s2557_s15] sm:$0xff] %v816_v57  ;;  %2010 = vtanh.f32 %v816_v57 }
 0x191   : > { %v2011_v59 = vpop.eup %2010 }
 0x192   : > { %v819_v60 = vmul.f32 %v2011_v59, %v2009_v58  }
 0x193 LB: >> { %v2576_v61 = vcombine.low %v2486_v15, %v2488_v16  ;;  %v2255_v62 = vmov 0.0   ;;  %v2582_v63 = vcombine.low %v2482_v13, %v2484_v14  ;;  %v2587_v0 = vcombine.low %v2523_v32, %v2525_v33  ;;  %s866_s21 = sadd.s32 1, %s2244_s21   ;;  %s2244_s21 = sphi %s2566_s21, %s866_s21   ;;  %v2240_v60 = vphi %v819_v60, %v2904_v60  }
 0x194   : >> { %1676 = vmatprep.subr.bf16.mxu0 %v2255_v62  ;;  %1696 = vmatprep.subr.bf16.mxu1 %v2255_v62  ;;  %vm2256_vm1 = vmmov 0   ;;  %v2595_v35 = vcombine.low %v2519_v30, %v2521_v31  ;;  %v2603_v36 = vcombine.low %v2478_v11, %v2480_v12  ;;  %v2609_v37 = vcombine.low %v2515_v28, %v2517_v29  ;;  %p863_p0 = scmp.ge.s32.totalorder %s866_s21, 3  }
 0x195   : >> { %1677 = vmatpush3.bf16.msra.mxu0 %v2576_v61  ;;  %1692 = vmatprep.mubr.msk.bf16.mxu0 %vm2256_vm1, %v2255_v62  ;;  %v2615_v38 = vcombine.low %v2474_v9, %v2476_v10  ;;  %v2623_v39 = vcombine.low %v2470_v7, %v2472_v8  ;;  %v2629_v40 = vcombine.low %v2466_v5, %v2468_v6  ;;  %s1599_s18 = sshll.u32 (%p863_p0), %s2335_s17, 7  ;;  %s1344_s30 = sshll.u32 (%p863_p0), %s2562_s19, 4  ;;  %s1345_s30 = int_to_ptr.vmem [resolvable:$true] %s1344_s30 }
 0x196   : >> { %1678 = vmatprep.subr.bf16.mxu0 %v2255_v62  ;;  %1697 = vmatpush3.bf16.msra.mxu1 %v2587_v0  ;;  %v2635_v41 = vcombine.low %v2462_v3, %v2464_v4  ;;  %v2641_v42 = vcombine.low %v2458_v1, %v2460_v2  ;;  %v868_v43 = vpack.c.bf16 %v2240_v60, %v2240_v60  ;;  %s1342_s25 = scalar_lea.hbm (%p863_p0), %s2876_s9, %s1599_s18  ;;  %s1326_s26 = scalar_lea.sflag (%p863_p0), [#allocation4], %s2440_s5 }
 0x197   : >> { %1712 = vmatprep.mubr.msk.bf16.mxu1 %vm2256_vm1, %v2255_v62  ;;  %1698 = vmatprep.subr.bf16.mxu1 %v2255_v62  ;;  %v2668_v44 = vcombine.low %v2511_v26, %v2513_v27  ;;  %v2674_v45 = vcombine.low %v2507_v24, %v2509_v25  ;;  %v2680_v46 = vcombine.low %v2503_v22, %v2505_v23  ;;  %s2126_s11 = scalar_lea.vmem (%p863_p0), %s1345_s30, 128  ;;  %p2905_p10 = scmp.ne.s32.totalorder (%p863_p0), %s2896_s27, 0 }
 0x198   : >> { %v2685_v48 = vcombine.low %v2499_v20, %v2501_v21  ;;  %v2691_v49 = vcombine.low %v2495_v18, %v2497_v19  ;;  %p2127_p5 = scmp.ne.s32.totalorder (%p863_p0), %s1345_s30, %s2126_s11  ;;  %s2257_s22 = smov (%p863_p0), [#allocation10]  }
 0x199   : >> { %1679 = vmatpush3.bf16.msra.mxu0 %v2582_v63  ;;  %s2130_s23 = sshll.u32 (%p863_p0), %s2257_s22, 4  ;;  %s2131_s23 = int_to_ptr.vmem [resolvable:$false] %s2130_s23 }
 0x19a   : >> { %1680 = vmatprep.subr.bf16.mxu0 %v2255_v62  ;;  %1699 = vmatpush3.bf16.msra.mxu1 %v2595_v35  ;;  %p2128_p1 = pnand (%p863_p0), %p2127_p5, %p2905_p10  ;;  %s2132_s7 = scalar_lea.vmem (%p863_p0), %s2131_s23, 256 }
 0x19b   : >> { %1700 = vmatprep.subr.bf16.mxu1 %v2255_v62  ;;  %p2133_p3 = scmp.lt.s32.totalorder (%p863_p0), %s1345_s30, %s2131_s23  ;;  %p2134_p9 = scmp.lt.s32.totalorder (%p863_p0), %s2132_s7, %s2126_s11 }
 0x19c   : > { %p2129_p2 = pneg (%p863_p0), %p2128_p1 }
 0x19d   : >> { %1681 = vmatpush3.bf16.msra.mxu0 %v2603_v36  ;;  %p2135_p13 = por (%p863_p0), %p2134_p9, %p2133_p3 }
 0x19e   : >> { %1682 = vmatprep.subr.bf16.mxu0 %v2255_v62  ;;  %1701 = vmatpush3.bf16.msra.mxu1 %v2609_v37 }
 0x19f   : >> { %1702 = vmatprep.subr.bf16.mxu1 %v2255_v62  ;;  %p2136_p7 = pnand (%p863_p0), %p2135_p13, %p2129_p2 }
 0x1a1   : >> { %1683 = vmatpush3.bf16.msra.mxu0 %v2615_v38 }
 0x1a2   : >> { %1684 = vmatprep.subr.bf16.mxu0 %v2255_v62  ;;  %1703 = vmatpush3.bf16.msra.mxu1 %v2668_v44 }
 0x1a3   : >> { %1704 = vmatprep.subr.bf16.mxu1 %v2255_v62 }
 0x1a5   : >> { %1685 = vmatpush3.bf16.msra.mxu0 %v2623_v39 }
 0x1a6   : >> { %1686 = vmatprep.subr.bf16.mxu0 %v2255_v62  ;;  %1705 = vmatpush3.bf16.msra.mxu1 %v2674_v45 }
 0x1a7   : >> { %1706 = vmatprep.subr.bf16.mxu1 %v2255_v62 }
 0x1a9   : >> { %1687 = vmatpush3.bf16.msra.mxu0 %v2629_v40 }
 0x1aa   : >> { %1688 = vmatprep.subr.bf16.mxu0 %v2255_v62  ;;  %1707 = vmatpush3.bf16.msra.mxu1 %v2680_v46 }
 0x1ab   : >> { %1708 = vmatprep.subr.bf16.mxu1 %v2255_v62 }
 0x1ad   : >> { %1689 = vmatpush3.bf16.msra.mxu0 %v2635_v41 }
 0x1ae   : >> { %1690 = vmatprep.subr.bf16.mxu0 %v2255_v62  ;;  %1709 = vmatpush3.bf16.msra.mxu1 %v2685_v48 }
 0x1af   : >> { %1710 = vmatprep.subr.bf16.mxu1 %v2255_v62 }
 0x1b1   : >> { %1691 = vmatpush3.bf16.msra.mxu0 %v2641_v42 }
 0x1b2   : >> { %1716 = vmatprep.subr.bf16.mxu0 %v2255_v62  ;;  %1711 = vmatpush3.bf16.msra.mxu1 %v2691_v49 }
 0x1b3   : >> { %1736 = vmatprep.subr.bf16.mxu1 %v2255_v62 }
 0x1b4   : >> { %1693 = vmatmul.mubr.bf16.vlgmr.msra.gmra.mxu0 %v868_v43 }
 0x1b5   : >> { %1717 = vmatpush3.bf16.msra.mxu0 %v2576_v61  ;;  %1732 = vmatprep.mubr.msk.bf16.mxu0 %vm2256_vm1, %v2255_v62 }
 0x1b6   : >> { %1718 = vmatprep.subr.bf16.mxu0 %v2255_v62 }
 0x1b9   : >> { %1719 = vmatpush3.bf16.msra.mxu0 %v2582_v63 }
 0x1ba   : >> { %1720 = vmatprep.subr.bf16.mxu0 %v2255_v62 }
 0x1bd   : >> { %1721 = vmatpush3.bf16.msra.mxu0 %v2603_v36 }
 0x1be   : >> { %1722 = vmatprep.subr.bf16.mxu0 %v2255_v62 }
 0x1c1   : >> { %1723 = vmatpush3.bf16.msra.mxu0 %v2615_v38 }
 0x1c2   : >> { %1724 = vmatprep.subr.bf16.mxu0 %v2255_v62 }
 0x1c5   : >> { %1725 = vmatpush3.bf16.msra.mxu0 %v2623_v39 }
 0x1c6   : >> { %1726 = vmatprep.subr.bf16.mxu0 %v2255_v62 }
 0x1c9   : >> { %1727 = vmatpush3.bf16.msra.mxu0 %v2629_v40 }
 0x1ca   : >> { %1728 = vmatprep.subr.bf16.mxu0 %v2255_v62 }
 0x1cd   : >> { %1729 = vmatpush3.bf16.msra.mxu0 %v2635_v41 }
 0x1ce   : >> { %1730 = vmatprep.subr.bf16.mxu0 %v2255_v62 }
 0x1d1   : >> { %1731 = vmatpush3.bf16.msra.mxu0 %v2641_v42 }
 0x1d2   : >> { %1756 = vmatprep.subr.bf16.mxu0 %v2255_v62 }
 0x274   : >> { %v957_v50 = vpop.f32.mrf.mxu0 }
 0x275   : >> { %v958_v51 = vadd.f32 %v2493_v17, %v957_v50 }
 0x276   : >> { %v1694_v52 = vpop.f32.mrf.mxu0 }
 0x277   : >> { %2012 = vtanh.f32 %v958_v51 }
 0x278   : >> { %v960_v53 = vpop.f32.mrf.mxu0 }
 0x27a   : >> { %v1695_v54 = vpop.f32.mrf.mxu0 }
 0x284   : >> { %v2013_v55 = vpop.eup %2012 }
 0x285   : >> { %v964_v56 = vpack.c.bf16 %v2013_v55, %v2013_v55 }
 0x287   : >> { %1713 = vmatmul.mubr.bf16.vlgmr.msra.gmra.mxu1 %v964_v56 }
 0x288   : >> { %1737 = vmatpush3.bf16.msra.mxu1 %v2587_v0  ;;  %1752 = vmatprep.mubr.msk.bf16.mxu1 %vm2256_vm1, %v2255_v62 }
 0x289   : >> { %1738 = vmatprep.subr.bf16.mxu1 %v2255_v62 }
 0x28c   : >> { %1739 = vmatpush3.bf16.msra.mxu1 %v2595_v35 }
 0x28d   : >> { %1740 = vmatprep.subr.bf16.mxu1 %v2255_v62 }
 0x290   : >> { %1741 = vmatpush3.bf16.msra.mxu1 %v2609_v37 }
 0x291   : >> { %1742 = vmatprep.subr.bf16.mxu1 %v2255_v62 }
 0x294   : >> { %1743 = vmatpush3.bf16.msra.mxu1 %v2668_v44 }
 0x295   : >> { %1744 = vmatprep.subr.bf16.mxu1 %v2255_v62 }
 0x298   : >> { %1745 = vmatpush3.bf16.msra.mxu1 %v2674_v45 }
 0x299   : >> { %1746 = vmatprep.subr.bf16.mxu1 %v2255_v62 }
 0x29c   : >> { %1747 = vmatpush3.bf16.msra.mxu1 %v2680_v46 }
 0x29d   : >> { %1748 = vmatprep.subr.bf16.mxu1 %v2255_v62 }
 0x2a0   : >> { %1749 = vmatpush3.bf16.msra.mxu1 %v2685_v48 }
 0x2a1   : >> { %1750 = vmatprep.subr.bf16.mxu1 %v2255_v62 }
 0x2a4   : >> { %1751 = vmatpush3.bf16.msra.mxu1 %v2691_v49 }
 0x2a5   : >> { %1776 = vmatprep.subr.bf16.mxu1 %v2255_v62 }
 0x347   : >> { %v1053_v57 = vpop.f32.mrf.mxu1 }
 0x348   : >> { %v2716_v58 = vadd.f32 %v2530_v34, %v1053_v57 }
 0x349   : >> { %v1714_v59 = vpop.f32.mrf.mxu1 }
 0x34a   : >> { %v1059_v43 = vmul.f32 %v2716_v58, %v2545_v47 }
 0x34b   : >> { %v1056_v50 = vpop.f32.mrf.mxu1 }
 0x34c   : >> { %v1060_v51 = vmul.f32 0.5, %v1059_v43 }
 0x34d   : >> { %v1715_v52 = vpop.f32.mrf.mxu1 }
 0x34e   : >> { %v1061_v53 = vadd.f32 %v2240_v60, %v1060_v51 }
 0x350   : >> { %v1062_v54 = vpack.c.bf16 %v1061_v53, %v1061_v53 }
 0x352   : >> { %1733 = vmatmul.mubr.bf16.vlgmr.msra.gmra.mxu0 %v1062_v54 }
 0x353   : >> { %1757 = vmatpush3.bf16.msra.mxu0 %v2576_v61  ;;  %1772 = vmatprep.mubr.msk.bf16.mxu0 %vm2256_vm1, %v2255_v62 }
 0x354   : >> { %1758 = vmatprep.subr.bf16.mxu0 %v2255_v62 }
 0x357   : >> { %1759 = vmatpush3.bf16.msra.mxu0 %v2582_v63 }
 0x358   : >> { %1760 = vmatprep.subr.bf16.mxu0 %v2255_v62 }
 0x35b   : >> { %1761 = vmatpush3.bf16.msra.mxu0 %v2603_v36 }
 0x35c   : >> { %1762 = vmatprep.subr.bf16.mxu0 %v2255_v62 }
 0x35f   : >> { %1763 = vmatpush3.bf16.msra.mxu0 %v2615_v38 }
 0x360   : >> { %1764 = vmatprep.subr.bf16.mxu0 %v2255_v62 }
 0x363   : >> { %1765 = vmatpush3.bf16.msra.mxu0 %v2623_v39 }
 0x364   : >> { %1766 = vmatprep.subr.bf16.mxu0 %v2255_v62 }
 0x367   : >> { %1767 = vmatpush3.bf16.msra.mxu0 %v2629_v40 }
 0x368   : >> { %1768 = vmatprep.subr.bf16.mxu0 %v2255_v62 }
 0x36b   : >> { %1769 = vmatpush3.bf16.msra.mxu0 %v2635_v41 }
 0x36c   : >> { %1770 = vmatprep.subr.bf16.mxu0 %v2255_v62 }
 0x36f   : >> { %1771 = vmatpush3.bf16.msra.mxu0 %v2641_v42 }
 0x370   : >> { %1796 = vmatprep.subr.bf16.mxu0 %v2255_v62 }
 0x412   : >> { %v1097_v55 = vpop.f32.mrf.mxu0 }
 0x413   : >> { %v1098_v56 = vadd.f32 %v2493_v17, %v1097_v55 }
 0x414   : >> { %v1734_v57 = vpop.f32.mrf.mxu0 }
 0x415   : >> { %2014 = vtanh.f32 %v1098_v56 }
 0x416   : >> { %v1100_v59 = vpop.f32.mrf.mxu0 }
 0x418   : >> { %v1735_v43 = vpop.f32.mrf.mxu0 }
 0x422   : >> { %v2015_v50 = vpop.eup %2014 }
 0x423   : >> { %v1104_v51 = vpack.c.bf16 %v2015_v50, %v2015_v50 }
 0x425   : >> { %1753 = vmatmul.mubr.bf16.vlgmr.msra.gmra.mxu1 %v1104_v51 }
 0x426   : >> { %1777 = vmatpush3.bf16.msra.mxu1 %v2587_v0  ;;  %1792 = vmatprep.mubr.msk.bf16.mxu1 %vm2256_vm1, %v2255_v62 }
 0x427   : >> { %1778 = vmatprep.subr.bf16.mxu1 %v2255_v62 }
 0x42a   : >> { %1779 = vmatpush3.bf16.msra.mxu1 %v2595_v35 }
 0x42b   : >> { %1780 = vmatprep.subr.bf16.mxu1 %v2255_v62 }
 0x42e   : >> { %1781 = vmatpush3.bf16.msra.mxu1 %v2609_v37 }
 0x42f   : >> { %1782 = vmatprep.subr.bf16.mxu1 %v2255_v62 }
 0x432   : >> { %1783 = vmatpush3.bf16.msra.mxu1 %v2668_v44 }
 0x433   : >> { %1784 = vmatprep.subr.bf16.mxu1 %v2255_v62 }
 0x436   : >> { %1785 = vmatpush3.bf16.msra.mxu1 %v2674_v45 }
 0x437   : >> { %1786 = vmatprep.subr.bf16.mxu1 %v2255_v62 }
 0x43a   : >> { %1787 = vmatpush3.bf16.msra.mxu1 %v2680_v46 }
 0x43b   : >> { %1788 = vmatprep.subr.bf16.mxu1 %v2255_v62 }
 0x43e   : >> { %1789 = vmatpush3.bf16.msra.mxu1 %v2685_v48 }
 0x43f   : >> { %1790 = vmatprep.subr.bf16.mxu1 %v2255_v62 }
 0x442   : >> { %1791 = vmatpush3.bf16.msra.mxu1 %v2691_v49 }
 0x443   : >> { %1816 = vmatprep.subr.bf16.mxu1 %v2255_v62 }
 0x4e5   : >> { %v1139_v52 = vpop.f32.mrf.mxu1 }
 0x4e6   : >> { %v1140_v53 = vadd.f32 %v2530_v34, %v1139_v52 }
 0x4e7   : >> { %v1754_v54 = vpop.f32.mrf.mxu1 }
 0x4e8   : >> { %v1145_v55 = vmul.f32 %v1140_v53, %v2545_v47 }
 0x4e9   : >> { %v1142_v56 = vpop.f32.mrf.mxu1 }
 0x4ea   : >> { %v1146_v57 = vmul.f32 0.5, %v1145_v55 }
 0x4eb   : >> { %v1755_v59 = vpop.f32.mrf.mxu1 }
 0x4ec   : >> { %v1147_v43 = vadd.f32 %v2240_v60, %v1146_v57 }
 0x4ee   : >> { %v1148_v50 = vpack.c.bf16 %v1147_v43, %v1147_v43 }
 0x4f0   : >> { %1773 = vmatmul.mubr.bf16.vlgmr.msra.gmra.mxu0 %v1148_v50 }
 0x4f1   : >> { %1797 = vmatpush3.bf16.msra.mxu0 %v2576_v61  ;;  %1812 = vmatprep.mubr.msk.bf16.mxu0 %vm2256_vm1, %v2255_v62 }
 0x4f2   : >> { %1798 = vmatprep.subr.bf16.mxu0 %v2255_v62 }
 0x4f5   : >> { %1799 = vmatpush3.bf16.msra.mxu0 %v2582_v63 }
 0x4f6   : >> { %1800 = vmatprep.subr.bf16.mxu0 %v2255_v62 }
 0x4f9   : >> { %1801 = vmatpush3.bf16.msra.mxu0 %v2603_v36 }
 0x4fa   : >> { %1802 = vmatprep.subr.bf16.mxu0 %v2255_v62 }
 0x4fd   : >> { %1803 = vmatpush3.bf16.msra.mxu0 %v2615_v38 }
 0x4fe   : >> { %1804 = vmatprep.subr.bf16.mxu0 %v2255_v62 }
 0x501   : >> { %1805 = vmatpush3.bf16.msra.mxu0 %v2623_v39 }
 0x502   : >> { %1806 = vmatprep.subr.bf16.mxu0 %v2255_v62 }
 0x505   : >> { %1807 = vmatpush3.bf16.msra.mxu0 %v2629_v40 }
 0x506   : >> { %1808 = vmatprep.subr.bf16.mxu0 %v2255_v62 }
 0x509   : >> { %1809 = vmatpush3.bf16.msra.mxu0 %v2635_v41 }
 0x50a   : >> { %1810 = vmatprep.subr.bf16.mxu0 %v2255_v62 }
 0x50d   : >> { %1811 = vmatpush3.bf16.msra.mxu0 %v2641_v42 }
 0x5b0   : >> { %v1183_v61 = vpop.f32.mrf.mxu0 }
 0x5b1   : >> { %v1184_v63 = vadd.f32 %v2493_v17, %v1183_v61 }
 0x5b2   : >> { %v1774_v36 = vpop.f32.mrf.mxu0 }
 0x5b3   : >> { %2016 = vtanh.f32 %v1184_v63 }
 0x5b4   : >> { %v1186_v38 = vpop.f32.mrf.mxu0 }
 0x5b6   : >> { %v1775_v51 = vpop.f32.mrf.mxu0 }
 0x5c0   : >> { %v2017_v39 = vpop.eup %2016 }
 0x5c1   : >> { %v1190_v52 = vpack.c.bf16 %v2017_v39, %v2017_v39 }
 0x5c3   : >> { %1793 = vmatmul.mubr.bf16.vlgmr.msra.gmra.mxu1 %v1190_v52 }
 0x5c4   : >> { %1817 = vmatpush3.bf16.msra.mxu1 %v2587_v0  ;;  %1832 = vmatprep.mubr.msk.bf16.mxu1 %vm2256_vm1, %v2255_v62  ;;  %v1316_v0 = vmul.f32 2.0, %v1140_v53 }
 0x5c5   : >> { %1818 = vmatprep.subr.bf16.mxu1 %v2255_v62 }
 0x5c6   : >> { %v1317_v41 = vadd.f32 %v1316_v0, %v2716_v58 }
 0x5c8   : >> { %1819 = vmatpush3.bf16.msra.mxu1 %v2595_v35 }
 0x5c9   : >> { %1820 = vmatprep.subr.bf16.mxu1 %v2255_v62 }
 0x5cc   : >> { %1821 = vmatpush3.bf16.msra.mxu1 %v2609_v37 }
 0x5cd   : >> { %1822 = vmatprep.subr.bf16.mxu1 %v2255_v62 }
 0x5d0   : >> { %1823 = vmatpush3.bf16.msra.mxu1 %v2668_v44 }
 0x5d1   : >> { %1824 = vmatprep.subr.bf16.mxu1 %v2255_v62 }
 0x5d4   : >> { %1825 = vmatpush3.bf16.msra.mxu1 %v2674_v45 }
 0x5d5   : >> { %1826 = vmatprep.subr.bf16.mxu1 %v2255_v62 }
 0x5d8   : >> { %1827 = vmatpush3.bf16.msra.mxu1 %v2680_v46 }
 0x5d9   : >> { %1828 = vmatprep.subr.bf16.mxu1 %v2255_v62 }
 0x5dc   : >> { %1829 = vmatpush3.bf16.msra.mxu1 %v2685_v48 }
 0x5dd   : >> { %1830 = vmatprep.subr.bf16.mxu1 %v2255_v62 }
 0x5e0   : >> { %1831 = vmatpush3.bf16.msra.mxu1 %v2691_v49 }
 0x683   : >> { %v1225_v35 = vpop.f32.mrf.mxu1 }
 0x684   : >> { %v1226_v37 = vadd.f32 %v2530_v34, %v1225_v35 }
 0x685   : >> { %v1794_v40 = vpop.f32.mrf.mxu1 }
 0x686   : >> { %v1231_v42 = vmul.f32 %v1226_v37, %v2545_v47  ;;  %v1318_v44 = vmul.f32 2.0, %v1226_v37 }
 0x687   : >> { %v1228_v45 = vpop.f32.mrf.mxu1 }
 0x688   : >> { %v1232_v46 = vadd.f32 %v2240_v60, %v1231_v42  ;;  %v1319_v54 = vadd.f32 %v1318_v44, %v1317_v41 }
 0x689   : >> { %v1795_v55 = vpop.f32.mrf.mxu1 }
 0x68a   : >> { %v1233_v48 = vpack.c.bf16 %v1232_v46, %v1232_v46 }
 0x68c   : >> { %1813 = vmatmul.mubr.bf16.vlgmr.msra.gmra.mxu0 %v1233_v48 }
 0x74c   : >> { %v1268_v62 = vpop.f32.mrf.mxu0 }
 0x74d   : >> { %v1269_v49 = vadd.f32 %v2493_v17, %v1268_v62 }
 0x74e   : >> { %v1814_v53 = vpop.f32.mrf.mxu0 }
 0x74f   : >> { %2018 = vtanh.f32 %v1269_v49 }
 0x750   : >> { %v1271_v56 = vpop.f32.mrf.mxu0 }
 0x752   : >> { %v1815_v57 = vpop.f32.mrf.mxu0 }
 0x75c   : >> { %v2019_v59 = vpop.eup %2018 }
 0x75d   : >> { %v1275_v43 = vpack.c.bf16 %v2019_v59, %v2019_v59 }
 0x75f   : >> { %1833 = vmatmul.mubr.bf16.vlgmr.msra.gmra.mxu1 %v1275_v43 }
 0x81f   : >> { %v1310_v58 = vpop.f32.mrf.mxu1 }
 0x820   : >> { %v1311_v50 = vadd.f32 %v2530_v34, %v1310_v58 }
 0x821   : >> { %v1834_v61 = vpop.f32.mrf.mxu1 }
 0x822   : >> { %v1320_v63 = vadd.f32 %v1319_v54, %v1311_v50 }
 0x823   : >> { %v1313_v36 = vpop.f32.mrf.mxu1 }
 0x824   : >> { %v1321_v38 = vmul.f32 0.16666667, %v1320_v63 }
 0x825   : >> { %v1835_v51 = vpop.f32.mrf.mxu1 }
 0x826   : >> { %v1322_v39 = vmul.f32 %v1321_v38, %v2545_v47  ;;  %865 = sbr.rel (!%p863_p0) target bundleno = 403 (0x193), region = 143 }
 0x828   : >> { %v1323_v52 = vadd.f32 %v2240_v60, %v1322_v39  }
 0x82a   : >> { %v2904_v60 = vmov %v1323_v52  ;;  %1324 = vst [vmem:[%s2562_s19] sm:$0xff] (%p863_p0), %v1323_v52 }
 0x82b   : > { %2139 = shalt.err (!%p2136_p7)
}
 0x82c   : > { %s2140_s3 = scalar_lea.hbm %s1342_s25, 128  ;;  %s2144_s21 = scalar_lea.hbm %s2876_s9, 256 }
 0x82d   : > { %p2141_p4 = scmp.ne.s32.totalorder %s1342_s25, %s2140_s3  ;;  %p2145_p11 = scmp.lt.s32.totalorder %s1342_s25, %s2876_s9 }
 0x82e   : > { %p2146_p12 = scmp.lt.s32.totalorder %s2144_s21, %s2140_s3 }
 0x82f   : > { %p2142_p8 = pnand %p2141_p4, %p2905_p10 }
 0x830   : > { %p2147_p0 = por %p2146_p12, %p2145_p11 }
 0x831   : > { %p2143_p6 = pneg %p2142_p8 }
 0x833   : > { %p2148_p5 = pnand %p2147_p0, %p2143_p6 }
 0x835   : > { %2151 = shalt.err (!%p2148_p5)
}
 0x836   : > { %1850 = dma.vmem_to_hbm [thread:$0]  (%p2905_p10), %s1345_s30, 128, %s1342_s25, %s1326_s26  }
 0x837   : > { %s1355_s23 = scalar_lea.hbm %s2877_s10, %s1599_s18  ;;  %s1357_s7 = sshll.u32 %s2557_s15, 4  ;;  %s1358_s7 = int_to_ptr.vmem [resolvable:$true] %s1357_s7 }
 0x838   : > { %s1331_s24 = scalar_lea.sflag [#allocation12], %s2440_s5  ;;  %s2152_s19 = scalar_lea.vmem %s1358_s7, 128 }
 0x839   : > { %p2153_p1 = scmp.ne.s32.totalorder %s1358_s7, %s2152_s19  ;;  %s2258_s3 = smov [#allocation11]  }
 0x83a   : > { %s2156_s21 = sshll.u32 %s2258_s3, 4  ;;  %s2157_s21 = int_to_ptr.vmem [resolvable:$false] %s2156_s21 }
 0x83b   : > { %p2154_p2 = pnand %p2153_p1, %p2905_p10  ;;  %s2158_s28 = scalar_lea.vmem %s2157_s21, 256 }
 0x83c   : > { %p2159_p9 = scmp.lt.s32.totalorder %s1358_s7, %s2157_s21  ;;  %p2160_p13 = scmp.lt.s32.totalorder %s2158_s28, %s2152_s19 }
 0x83d   : > { %p2155_p3 = pneg %p2154_p2 }
 0x83e   : > { %p2161_p7 = por %p2160_p13, %p2159_p9 }
 0x840   : > { %p2162_p4 = pnand %p2161_p7, %p2155_p3 }
 0x842   : > { %2165 = shalt.err (!%p2162_p4)
}
 0x843   : > { %s2166_s17 = scalar_lea.hbm %s1355_s23, 128  ;;  %s2170_s18 = scalar_lea.hbm %s2877_s10, 256 }
 0x844   : > { %p2167_p8 = scmp.ne.s32.totalorder %s1355_s23, %s2166_s17  ;;  %p2171_p12 = scmp.lt.s32.totalorder %s1355_s23, %s2877_s10 }
 0x845   : > { %p2172_p0 = scmp.lt.s32.totalorder %s2170_s18, %s2166_s17 }
 0x846   : > { %p2168_p6 = pnand %p2167_p8, %p2905_p10 }
 0x847   : > { %p2173_p5 = por %p2172_p0, %p2171_p12 }
 0x848   : > { %p2169_p11 = pneg %p2168_p6 }
 0x84a   : > { %p2174_p1 = pnand %p2173_p5, %p2169_p11 }
 0x84c   : > { %2177 = shalt.err (!%p2174_p1)
}
 0x84d   : > { %1851 = dma.vmem_to_hbm [thread:$0]  (%p2905_p10), %s1358_s7, 128, %s1355_s23, %s1331_s24  }
 0x84e PF: > { %s1369_s26 = sand.u32 1, %s2224_s13   ;;  %p2906_p2 = scmp.ne.s32.totalorder %s2888_s20, 0 }
 0x84f   : > { %p2907_p3 = scmp.ge.s32.totalorder %s2236_s16, 2  ;;  %s1370_s12 = scalar_lea.sflag [#allocation4], %s1369_s26 }
 0x851   : > { %p1869_p9 = pnand %p2907_p3, %p2906_p2 }
 0x853   : > { %p1870_p13 = pneg %p1869_p9 }
 0x855   : > { %2215 = dma.done.wait (%p1870_p13), %s1370_s12, 128  }
 0x856   : > { %2217 = vsyncadd (%p1870_p13), %s1370_s12, 4294967168  ;;  %s1379_s11 = scalar_lea.sflag [#allocation12], %s1369_s26 }
 0x857   : > { %2219 = dma.done.wait (%p1870_p13), %s1379_s11, 128  }
 0x858   : > { %2221 = vsyncadd (%p1870_p13), %s1379_s11, 4294967168  ;;  %s2908_s22 = sld [smem:[#allocation18_spill]]  ;;  %p29_p10 = scmp.ge.s32.totalorder %s2386_s29, 4  }
 0x859   : > { %s2909_s15 = sld [smem:[#allocation19_spill]]  ;;  %s2910_s13 = smov %s2228_s14 }
 0x85a   : > { %s2912_s16 = smov %s2386_s29  ;;  %31 = sbr.rel (!%p29_p10) target bundleno = 13 (0xd), region = 154 }
 0x85e   : > { %s2911_s14 = smov %s2908_s22 }
 0x85f   :  { %1384 = vsyncpa [#allocation3], 1 }
 0x860   :  { %1386 = vsyncpa [#allocation3 + $0x1], 1 }
 0x861   :  { %1387 = vsyncpa [#allocation6], 1 }
 0x862   :  { %1388 = vsyncpa [#allocation9], 1 }
 0x863   :  { %1389 = vsyncpa [#allocation4], 1 }
 0x864   :  { %1391 = vsyncpa [#allocation4 + $0x1], 1 }
 0x865   :  { %1392 = vsyncpa [#allocation12], 1 }
 0x866   :  { %1394 = vsyncpa [#allocation12 + $0x1], 1 }

</bundles_post_ra>
